<compile_context>
chip_gen: v6e
topology: v6e:2x2x1
jax: 0.10.0
libtpu: 0.0.40
codegen_flags: <defaults>
</compile_context>

<pallas_src>
import functools
import math

import jax
import jax.numpy as jnp
from jax import lax
from jax.experimental import pallas as pl
from jax.experimental.pallas import tpu as pltpu


def _sigmoid(x):
    # logistic(x) == 0.5*(tanh(x/2)+1): one EUP tanh, no exp(-x) overflow.
    return 0.5 * (jnp.tanh(0.5 * x) + 1.0)


def _lstm_steps(gx, whh, T, B, H, hs_store=None):
    """Statically-unrolled LSTM recurrence.

    gx  : (T*B, 4H) precomputed X@Wih + b, time-major (row = t*B + b),
          gate column order [i, f, g, o] (PyTorch convention)
    whh : (H, 4H)
    hs_store : optional VMEM ref (T*B, H) receiving every h_t (for bulk proj)
    Returns the final hidden state h_{T-1}, shape (B, H).
    """
    h = jnp.zeros((B, H), jnp.float32)
    c = jnp.zeros((B, H), jnp.float32)
    for t in range(T):  # static unroll: T is small and known at trace time
        gates = gx[t * B:(t + 1) * B, :] + jnp.dot(
            h, whh, preferred_element_type=jnp.float32)          # (B, 4H)
        sig = _sigmoid(gates)            # full 128-lane EUP op
        tgh = jnp.tanh(gates)            # full 128-lane EUP op
        i = sig[:, 0 * H:1 * H]
        f = sig[:, 1 * H:2 * H]
        g = tgh[:, 2 * H:3 * H]
        o = sig[:, 3 * H:4 * H]
        c = f * c + i * g
        h = o * jnp.tanh(c)
        if hs_store is not None:
            hs_store[pl.ds(t * B, B), :] = h   # store is off the serial chain
    return h


def fused_forward_kernel(x_ref,
                         wih1_ref, whh1_ref, b1_ref, wpj1_ref, bpj1_ref,
                         wih2_ref, whh2_ref, b2_ref, wpj2_ref, bpj2_ref,
                         wfc_ref, bfc_ref,
                         out_ref,
                         hs_ref,
                         *, T, B):
    """Whole Encoder_Classifier forward in one kernel (2-layer config).

    x_ref  : (T*B, D)  time-major flattened input
    wih*   : (Din, 4H) columns in gate order [i, f, g, o]
    whh*   : (H, 4H)
    b*     : (1, 4H)   (= b_ih + b_hh, pre-fused)
    wpj*   : (H, H)    projection weight (pre-transposed)
    bpj*   : (1, H)
    wfc    : (1, H)    classifier weight (row vector)
    bfc    : (1, 1)
    out_ref: (1, 1)
    hs_ref : (T*B, H)  VMEM scratch for layer-1 hidden states
    """
    H = whh1_ref.shape[0]

    # ---------------- Layer 1: LSTM + tanh projection --------------------
    gx1 = jnp.dot(x_ref[...], wih1_ref[...],
                  preferred_element_type=jnp.float32) + b1_ref[...]  # (T*B,4H)
    _lstm_steps(gx1, whh1_ref[...], T, B, H, hs_store=hs_ref)
    # Bulk projection: one (T*B, H) @ (H, H) matmul + tanh.
    y1 = jnp.tanh(jnp.dot(hs_ref[...], wpj1_ref[...],
                          preferred_element_type=jnp.float32) + bpj1_ref[...])

    # ---------------- Layer 2: LSTM + tanh projection --------------------
    gx2 = jnp.dot(y1, wih2_ref[...],
                  preferred_element_type=jnp.float32) + b2_ref[...]  # (T*B,4H)
    h_last = _lstm_steps(gx2, whh2_ref[...], T, B, H)
    # Projection is per-timestep and the head only reads the last timestep,
    # so projecting just the final hidden state is exact.
    y2_last = jnp.tanh(jnp.dot(h_last, wpj2_ref[...],
                               preferred_element_type=jnp.float32)
                       + bpj2_ref[...])                               # (B, H)

    # ------------- Classifier head: sigmoid(fc(feat[0][-1])) -------------
    # (1,32)x(32,1) on the MXU is pure overhead -> VPU multiply + lane reduce.
    logit = jnp.sum(y2_last[0:1, :] * wfc_ref[...],
                    axis=-1, keepdims=True) + bfc_ref[...]            # (1, 1)
    out_ref[...] = _sigmoid(logit)


# --------------------------------------------------------------------------
# Parameter construction: deterministic, stored directly in kernel layout
# (pre-transposed weights, pre-fused bias) so the jitted forward does no
# per-call transpose/add ops.
# --------------------------------------------------------------------------
def init_params(key, input_size, dims):
    layers = []
    in_dim = input_size
    for h in dims:
        key, k1, k2, k3 = jax.random.split(key, 4)
        layers.append(dict(
            wih=jax.random.normal(k1, (in_dim, 4 * h), jnp.float32)
            * (1.0 / math.sqrt(in_dim)),                 # == W_ih^T
            whh=jax.random.normal(k2, (h, 4 * h), jnp.float32)
            * (1.0 / math.sqrt(h)),                      # == W_hh^T
            b=jnp.zeros((1, 4 * h), jnp.float32),        # == b_ih + b_hh
            wpj=jax.random.normal(k3, (h, h), jnp.float32)
            * (1.0 / math.sqrt(h)),                      # == W_proj^T
            bpj=jnp.zeros((1, h), jnp.float32),
        ))
        in_dim = h
    key, kf = jax.random.split(key)
    return dict(
        layers=layers,
        wfc=jax.random.normal(kf, (1, in_dim), jnp.float32)
        * (1.0 / math.sqrt(in_dim)),                     # fc weight row
        bfc=jnp.zeros((1, 1), jnp.float32),
    )


# --------------------------------------------------------------------------
# Forward pass (== Encoder_Classifier.forward), single fused pallas_call
# --------------------------------------------------------------------------
@jax.jit
def encoder_classifier_forward(audio_feature, feature_len, params):
    # audio_feature: (B, T, D) batch-first (PyTorch convention).
    # feature_len is propagated by the encoder (all sample_rate == 1), but the
    # PyTorch head indexes encode_feature[0][-1] (last padded timestep of
    # batch element 0), so enc_len never feeds the output — matched here.
    B, T, D = audio_feature.shape
    l1, l2 = params["layers"]
    H1 = l1["whh"].shape[0]
    # time-major flatten: row index = t*B + b
    x2d = jnp.transpose(audio_feature.astype(jnp.float32),
                        (1, 0, 2)).reshape(T * B, D)

    out = pl.pallas_call(
        functools.partial(fused_forward_kernel, T=T, B=B),
        out_shape=jax.ShapeDtypeStruct((1, 1), jnp.float32),
        in_specs=[pl.BlockSpec(memory_space=pltpu.MemorySpace.VMEM)] * 13,
        out_specs=pl.BlockSpec(memory_space=pltpu.MemorySpace.VMEM),
        scratch_shapes=[pltpu.VMEM((T * B, H1), jnp.float32)],
    )(x2d,
      l1["wih"], l1["whh"], l1["b"], l1["wpj"], l1["bpj"],
      l2["wih"], l2["whh"], l2["b"], l2["wpj"], l2["bpj"],
      params["wfc"], params["bfc"])
    return out.reshape(1)  # matches torch.sigmoid(self.fc(vec)) -> shape (1,)


# --------------------------------------------------------------------------
# Pure-JAX reference (sanity check only)
# --------------------------------------------------------------------------
def reference_forward(audio_feature, feature_len, params):
    x = audio_feature.astype(jnp.float32)
    B = x.shape[0]
    for layer in params["layers"]:
        H = layer["whh"].shape[0]
        wih, whh, b = layer["wih"], layer["whh"], layer["b"]

        def scan_fn(carry, x_t, wih=wih, whh=whh, b=b, H=H):
            h, c = carry
            gates = x_t @ wih + h @ whh + b
            i = jax.nn.sigmoid(gates[:, :H])
            f = jax.nn.sigmoid(gates[:, H:2 * H])
            g = jnp.tanh(gates[:, 2 * H:3 * H])
            o = jax.nn.sigmoid(gates[:, 3 * H:])
            c = f * c + i * g
            h = o * jnp.tanh(c)
            return (h, c), h

        init = (jnp.zeros((B, H)), jnp.zeros((B, H)))
        _, hs = lax.scan(scan_fn, init, jnp.transpose(x, (1, 0, 2)))  # (T,B,H)
        y = jnp.tanh(hs @ layer["wpj"] + layer["bpj"])
        x = jnp.transpose(y, (1, 0, 2))
    feat = x[0, -1]                                                   # (H,)
    logit = jnp.sum(feat * params["wfc"][0]) + params["bfc"][0, 0]
    return jax.nn.sigmoid(logit).reshape(1)


if __name__ == "__main__":
    B, T, D = 2, 8, 40
    dims = [32, 32]

    key = jax.random.PRNGKey(0)
    kp, kx = jax.random.split(key)
    params = init_params(kp, D, dims)
    audio_feature = jax.random.normal(kx, (B, T, D), jnp.float32)
    feature_len = jnp.array([T, T - 2], jnp.int32)

    out = encoder_classifier_forward(audio_feature, feature_len, params)
    out = jax.block_until_ready(out)

    ref = reference_forward(audio_feature, feature_len, params)
    assert out.shape == (1,), out.shape
    assert jnp.allclose(out, ref, atol=1e-4), (out, ref)
    print("KERNEL_OK")
</pallas_src>

<mosaic_0001>
module attributes {stable_mosaic.version = 11 : i64} {
  func.func @fused_forward_kernel(%arg0: memref<16x40xf32, #tpu.memory_space<vmem>>, %arg1: memref<40x128xf32, #tpu.memory_space<vmem>>, %arg2: memref<32x128xf32, #tpu.memory_space<vmem>>, %arg3: memref<1x128xf32, #tpu.memory_space<vmem>>, %arg4: memref<32x32xf32, #tpu.memory_space<vmem>>, %arg5: memref<1x32xf32, #tpu.memory_space<vmem>>, %arg6: memref<32x128xf32, #tpu.memory_space<vmem>>, %arg7: memref<32x128xf32, #tpu.memory_space<vmem>>, %arg8: memref<1x128xf32, #tpu.memory_space<vmem>>, %arg9: memref<32x32xf32, #tpu.memory_space<vmem>>, %arg10: memref<1x32xf32, #tpu.memory_space<vmem>>, %arg11: memref<1x32xf32, #tpu.memory_space<vmem>>, %arg12: memref<1x1xf32, #tpu.memory_space<vmem>>, %arg13: memref<1x1xf32, #tpu.memory_space<vmem>>, %arg14: memref<16x32xf32, #tpu.memory_space<vmem>>) attributes {dimension_semantics = [], scalar_prefetch = 0 : i64, scratch_operands = 1 : i64, tpu.core_type = #tpu.core_type<tc>} {
    %c0 = arith.constant 0 : index
    %c0_0 = arith.constant 0 : index
    %0 = vector.load %arg0[%c0, %c0_0] : memref<16x40xf32, #tpu.memory_space<vmem>>, vector<16x40xf32>
    %c0_1 = arith.constant 0 : index
    %c0_2 = arith.constant 0 : index
    %1 = vector.load %arg1[%c0_1, %c0_2] : memref<40x128xf32, #tpu.memory_space<vmem>>, vector<40x128xf32>
    %cst = arith.constant dense<0.000000e+00> : vector<16x128xf32>
    %2 = tpu.matmul %0, %1, %cst {dimension_numbers = #tpu.dot_dimension_numbers<[1], [0], [0], [1], [0, 0, 1, 1], [], []>} : vector<16x40xf32>, vector<40x128xf32>, vector<16x128xf32> -> vector<16x128xf32>
    %c0_3 = arith.constant 0 : index
    %c0_4 = arith.constant 0 : index
    %3 = vector.load %arg3[%c0_3, %c0_4] : memref<1x128xf32, #tpu.memory_space<vmem>>, vector<1x128xf32>
    %4 = vector.broadcast %3 : vector<1x128xf32> to vector<16x128xf32>
    %5 = arith.addf %2, %4 : vector<16x128xf32>
    %c0_5 = arith.constant 0 : index
    %c0_6 = arith.constant 0 : index
    %6 = vector.load %arg2[%c0_5, %c0_6] : memref<32x128xf32, #tpu.memory_space<vmem>>, vector<32x128xf32>
    %cst_7 = arith.constant 0.000000e+00 : f32
    %7 = vector.broadcast %cst_7 : f32 to vector<2x32xf32>
    %cst_8 = arith.constant 0.000000e+00 : f32
    %8 = vector.broadcast %cst_8 : f32 to vector<2x32xf32>
    %9 = vector.extract_strided_slice %5 {offsets = [0, 0], sizes = [2, 128], strides = [1, 1]} : vector<16x128xf32> to vector<2x128xf32>
    %cst_9 = arith.constant dense<0.000000e+00> : vector<2x128xf32>
    %10 = tpu.matmul %7, %6, %cst_9 {dimension_numbers = #tpu.dot_dimension_numbers<[1], [0], [0], [1], [0, 0, 1, 1], [], []>} : vector<2x32xf32>, vector<32x128xf32>, vector<2x128xf32> -> vector<2x128xf32>
    %11 = arith.addf %9, %10 : vector<2x128xf32>
    %cst_10 = arith.constant 5.000000e-01 : f32
    %12 = vector.broadcast %cst_10 : f32 to vector<2x128xf32>
    %13 = arith.mulf %12, %11 : vector<2x128xf32>
    %14 = math.tanh %13 : vector<2x128xf32>
    %cst_11 = arith.constant 1.000000e+00 : f32
    %15 = vector.broadcast %cst_11 : f32 to vector<2x128xf32>
    %16 = arith.addf %14, %15 : vector<2x128xf32>
    %cst_12 = arith.constant 5.000000e-01 : f32
    %17 = vector.broadcast %cst_12 : f32 to vector<2x128xf32>
    %18 = arith.mulf %17, %16 : vector<2x128xf32>
    %19 = math.tanh %11 : vector<2x128xf32>
    %20 = vector.extract_strided_slice %18 {offsets = [0, 0], sizes = [2, 32], strides = [1, 1]} : vector<2x128xf32> to vector<2x32xf32>
    %21 = vector.extract_strided_slice %18 {offsets = [0, 32], sizes = [2, 32], strides = [1, 1]} : vector<2x128xf32> to vector<2x32xf32>
    %22 = vector.extract_strided_slice %19 {offsets = [0, 64], sizes = [2, 32], strides = [1, 1]} : vector<2x128xf32> to vector<2x32xf32>
    %23 = vector.extract_strided_slice %18 {offsets = [0, 96], sizes = [2, 32], strides = [1, 1]} : vector<2x128xf32> to vector<2x32xf32>
    %24 = arith.mulf %21, %8 : vector<2x32xf32>
    %25 = arith.mulf %20, %22 : vector<2x32xf32>
    %26 = arith.addf %24, %25 : vector<2x32xf32>
    %27 = math.tanh %26 : vector<2x32xf32>
    %28 = arith.mulf %23, %27 : vector<2x32xf32>
    %c0_13 = arith.constant 0 : index
    %c0_14 = arith.constant 0 : index
    %29 = vector.load %arg14[%c0_13, %c0_14] : memref<16x32xf32, #tpu.memory_space<vmem>>, vector<2x32xf32>
    tpu.vector_store %arg14[%c0_13, %c0_14], %28 {strides = array<i32>} : memref<16x32xf32, #tpu.memory_space<vmem>>, vector<2x32xf32>,
    %30 = vector.extract_strided_slice %5 {offsets = [2, 0], sizes = [2, 128], strides = [1, 1]} : vector<16x128xf32> to vector<2x128xf32>
    %cst_15 = arith.constant dense<0.000000e+00> : vector<2x128xf32>
    %31 = tpu.matmul %28, %6, %cst_15 {dimension_numbers = #tpu.dot_dimension_numbers<[1], [0], [0], [1], [0, 0, 1, 1], [], []>} : vector<2x32xf32>, vector<32x128xf32>, vector<2x128xf32> -> vector<2x128xf32>
    %32 = arith.addf %30, %31 : vector<2x128xf32>
    %cst_16 = arith.constant 5.000000e-01 : f32
    %33 = vector.broadcast %cst_16 : f32 to vector<2x128xf32>
    %34 = arith.mulf %33, %32 : vector<2x128xf32>
    %35 = math.tanh %34 : vector<2x128xf32>
    %cst_17 = arith.constant 1.000000e+00 : f32
    %36 = vector.broadcast %cst_17 : f32 to vector<2x128xf32>
    %37 = arith.addf %35, %36 : vector<2x128xf32>
    %cst_18 = arith.constant 5.000000e-01 : f32
    %38 = vector.broadcast %cst_18 : f32 to vector<2x128xf32>
    %39 = arith.mulf %38, %37 : vector<2x128xf32>
    %40 = math.tanh %32 : vector<2x128xf32>
    %41 = vector.extract_strided_slice %39 {offsets = [0, 0], sizes = [2, 32], strides = [1, 1]} : vector<2x128xf32> to vector<2x32xf32>
    %42 = vector.extract_strided_slice %39 {offsets = [0, 32], sizes = [2, 32], strides = [1, 1]} : vector<2x128xf32> to vector<2x32xf32>
    %43 = vector.extract_strided_slice %40 {offsets = [0, 64], sizes = [2, 32], strides = [1, 1]} : vector<2x128xf32> to vector<2x32xf32>
    %44 = vector.extract_strided_slice %39 {offsets = [0, 96], sizes = [2, 32], strides = [1, 1]} : vector<2x128xf32> to vector<2x32xf32>
    %45 = arith.mulf %42, %26 : vector<2x32xf32>
    %46 = arith.mulf %41, %43 : vector<2x32xf32>
    %47 = arith.addf %45, %46 : vector<2x32xf32>
    %48 = math.tanh %47 : vector<2x32xf32>
    %49 = arith.mulf %44, %48 : vector<2x32xf32>
    %c2 = arith.constant 2 : index
    %c0_19 = arith.constant 0 : index
    %50 = vector.load %arg14[%c2, %c0_19] : memref<16x32xf32, #tpu.memory_space<vmem>>, vector<2x32xf32>
    tpu.vector_store %arg14[%c2, %c0_19], %49 {strides = array<i32>} : memref<16x32xf32, #tpu.memory_space<vmem>>, vector<2x32xf32>,
    %51 = vector.extract_strided_slice %5 {offsets = [4, 0], sizes = [2, 128], strides = [1, 1]} : vector<16x128xf32> to vector<2x128xf32>
    %cst_20 = arith.constant dense<0.000000e+00> : vector<2x128xf32>
    %52 = tpu.matmul %49, %6, %cst_20 {dimension_numbers = #tpu.dot_dimension_numbers<[1], [0], [0], [1], [0, 0, 1, 1], [], []>} : vector<2x32xf32>, vector<32x128xf32>, vector<2x128xf32> -> vector<2x128xf32>
    %53 = arith.addf %51, %52 : vector<2x128xf32>
    %cst_21 = arith.constant 5.000000e-01 : f32
    %54 = vector.broadcast %cst_21 : f32 to vector<2x128xf32>
    %55 = arith.mulf %54, %53 : vector<2x128xf32>
    %56 = math.tanh %55 : vector<2x128xf32>
    %cst_22 = arith.constant 1.000000e+00 : f32
    %57 = vector.broadcast %cst_22 : f32 to vector<2x128xf32>
    %58 = arith.addf %56, %57 : vector<2x128xf32>
    %cst_23 = arith.constant 5.000000e-01 : f32
    %59 = vector.broadcast %cst_23 : f32 to vector<2x128xf32>
    %60 = arith.mulf %59, %58 : vector<2x128xf32>
    %61 = math.tanh %53 : vector<2x128xf32>
    %62 = vector.extract_strided_slice %60 {offsets = [0, 0], sizes = [2, 32], strides = [1, 1]} : vector<2x128xf32> to vector<2x32xf32>
    %63 = vector.extract_strided_slice %60 {offsets = [0, 32], sizes = [2, 32], strides = [1, 1]} : vector<2x128xf32> to vector<2x32xf32>
    %64 = vector.extract_strided_slice %61 {offsets = [0, 64], sizes = [2, 32], strides = [1, 1]} : vector<2x128xf32> to vector<2x32xf32>
    %65 = vector.extract_strided_slice %60 {offsets = [0, 96], sizes = [2, 32], strides = [1, 1]} : vector<2x128xf32> to vector<2x32xf32>
    %66 = arith.mulf %63, %47 : vector<2x32xf32>
    %67 = arith.mulf %62, %64 : vector<2x32xf32>
    %68 = arith.addf %66, %67 : vector<2x32xf32>
    %69 = math.tanh %68 : vector<2x32xf32>
    %70 = arith.mulf %65, %69 : vector<2x32xf32>
    %c4 = arith.constant 4 : index
    %c0_24 = arith.constant 0 : index
    %71 = vector.load %arg14[%c4, %c0_24] : memref<16x32xf32, #tpu.memory_space<vmem>>, vector<2x32xf32>
    tpu.vector_store %arg14[%c4, %c0_24], %70 {strides = array<i32>} : memref<16x32xf32, #tpu.memory_space<vmem>>, vector<2x32xf32>,
    %72 = vector.extract_strided_slice %5 {offsets = [6, 0], sizes = [2, 128], strides = [1, 1]} : vector<16x128xf32> to vector<2x128xf32>
    %cst_25 = arith.constant dense<0.000000e+00> : vector<2x128xf32>
    %73 = tpu.matmul %70, %6, %cst_25 {dimension_numbers = #tpu.dot_dimension_numbers<[1], [0], [0], [1], [0, 0, 1, 1], [], []>} : vector<2x32xf32>, vector<32x128xf32>, vector<2x128xf32> -> vector<2x128xf32>
    %74 = arith.addf %72, %73 : vector<2x128xf32>
    %cst_26 = arith.constant 5.000000e-01 : f32
    %75 = vector.broadcast %cst_26 : f32 to vector<2x128xf32>
    %76 = arith.mulf %75, %74 : vector<2x128xf32>
    %77 = math.tanh %76 : vector<2x128xf32>
    %cst_27 = arith.constant 1.000000e+00 : f32
    %78 = vector.broadcast %cst_27 : f32 to vector<2x128xf32>
    %79 = arith.addf %77, %78 : vector<2x128xf32>
    %cst_28 = arith.constant 5.000000e-01 : f32
    %80 = vector.broadcast %cst_28 : f32 to vector<2x128xf32>
    %81 = arith.mulf %80, %79 : vector<2x128xf32>
    %82 = math.tanh %74 : vector<2x128xf32>
    %83 = vector.extract_strided_slice %81 {offsets = [0, 0], sizes = [2, 32], strides = [1, 1]} : vector<2x128xf32> to vector<2x32xf32>
    %84 = vector.extract_strided_slice %81 {offsets = [0, 32], sizes = [2, 32], strides = [1, 1]} : vector<2x128xf32> to vector<2x32xf32>
    %85 = vector.extract_strided_slice %82 {offsets = [0, 64], sizes = [2, 32], strides = [1, 1]} : vector<2x128xf32> to vector<2x32xf32>
    %86 = vector.extract_strided_slice %81 {offsets = [0, 96], sizes = [2, 32], strides = [1, 1]} : vector<2x128xf32> to vector<2x32xf32>
    %87 = arith.mulf %84, %68 : vector<2x32xf32>
    %88 = arith.mulf %83, %85 : vector<2x32xf32>
    %89 = arith.addf %87, %88 : vector<2x32xf32>
    %90 = math.tanh %89 : vector<2x32xf32>
    %91 = arith.mulf %86, %90 : vector<2x32xf32>
    %c6 = arith.constant 6 : index
    %c0_29 = arith.constant 0 : index
    %92 = vector.load %arg14[%c6, %c0_29] : memref<16x32xf32, #tpu.memory_space<vmem>>, vector<2x32xf32>
    tpu.vector_store %arg14[%c6, %c0_29], %91 {strides = array<i32>} : memref<16x32xf32, #tpu.memory_space<vmem>>, vector<2x32xf32>,
    %93 = vector.extract_strided_slice %5 {offsets = [8, 0], sizes = [2, 128], strides = [1, 1]} : vector<16x128xf32> to vector<2x128xf32>
    %cst_30 = arith.constant dense<0.000000e+00> : vector<2x128xf32>
    %94 = tpu.matmul %91, %6, %cst_30 {dimension_numbers = #tpu.dot_dimension_numbers<[1], [0], [0], [1], [0, 0, 1, 1], [], []>} : vector<2x32xf32>, vector<32x128xf32>, vector<2x128xf32> -> vector<2x128xf32>
    %95 = arith.addf %93, %94 : vector<2x128xf32>
    %cst_31 = arith.constant 5.000000e-01 : f32
    %96 = vector.broadcast %cst_31 : f32 to vector<2x128xf32>
    %97 = arith.mulf %96, %95 : vector<2x128xf32>
    %98 = math.tanh %97 : vector<2x128xf32>
    %cst_32 = arith.constant 1.000000e+00 : f32
    %99 = vector.broadcast %cst_32 : f32 to vector<2x128xf32>
    %100 = arith.addf %98, %99 : vector<2x128xf32>
    %cst_33 = arith.constant 5.000000e-01 : f32
    %101 = vector.broadcast %cst_33 : f32 to vector<2x128xf32>
    %102 = arith.mulf %101, %100 : vector<2x128xf32>
    %103 = math.tanh %95 : vector<2x128xf32>
    %104 = vector.extract_strided_slice %102 {offsets = [0, 0], sizes = [2, 32], strides = [1, 1]} : vector<2x128xf32> to vector<2x32xf32>
    %105 = vector.extract_strided_slice %102 {offsets = [0, 32], sizes = [2, 32], strides = [1, 1]} : vector<2x128xf32> to vector<2x32xf32>
    %106 = vector.extract_strided_slice %103 {offsets = [0, 64], sizes = [2, 32], strides = [1, 1]} : vector<2x128xf32> to vector<2x32xf32>
    %107 = vector.extract_strided_slice %102 {offsets = [0, 96], sizes = [2, 32], strides = [1, 1]} : vector<2x128xf32> to vector<2x32xf32>
    %108 = arith.mulf %105, %89 : vector<2x32xf32>
    %109 = arith.mulf %104, %106 : vector<2x32xf32>
    %110 = arith.addf %108, %109 : vector<2x32xf32>
    %111 = math.tanh %110 : vector<2x32xf32>
    %112 = arith.mulf %107, %111 : vector<2x32xf32>
    %c8 = arith.constant 8 : index
    %c0_34 = arith.constant 0 : index
    %113 = vector.load %arg14[%c8, %c0_34] : memref<16x32xf32, #tpu.memory_space<vmem>>, vector<2x32xf32>
    tpu.vector_store %arg14[%c8, %c0_34], %112 {strides = array<i32>} : memref<16x32xf32, #tpu.memory_space<vmem>>, vector<2x32xf32>,
    %114 = vector.extract_strided_slice %5 {offsets = [10, 0], sizes = [2, 128], strides = [1, 1]} : vector<16x128xf32> to vector<2x128xf32>
    %cst_35 = arith.constant dense<0.000000e+00> : vector<2x128xf32>
    %115 = tpu.matmul %112, %6, %cst_35 {dimension_numbers = #tpu.dot_dimension_numbers<[1], [0], [0], [1], [0, 0, 1, 1], [], []>} : vector<2x32xf32>, vector<32x128xf32>, vector<2x128xf32> -> vector<2x128xf32>
    %116 = arith.addf %114, %115 : vector<2x128xf32>
    %cst_36 = arith.constant 5.000000e-01 : f32
    %117 = vector.broadcast %cst_36 : f32 to vector<2x128xf32>
    %118 = arith.mulf %117, %116 : vector<2x128xf32>
    %119 = math.tanh %118 : vector<2x128xf32>
    %cst_37 = arith.constant 1.000000e+00 : f32
    %120 = vector.broadcast %cst_37 : f32 to vector<2x128xf32>
    %121 = arith.addf %119, %120 : vector<2x128xf32>
    %cst_38 = arith.constant 5.000000e-01 : f32
    %122 = vector.broadcast %cst_38 : f32 to vector<2x128xf32>
    %123 = arith.mulf %122, %121 : vector<2x128xf32>
    %124 = math.tanh %116 : vector<2x128xf32>
    %125 = vector.extract_strided_slice %123 {offsets = [0, 0], sizes = [2, 32], strides = [1, 1]} : vector<2x128xf32> to vector<2x32xf32>
    %126 = vector.extract_strided_slice %123 {offsets = [0, 32], sizes = [2, 32], strides = [1, 1]} : vector<2x128xf32> to vector<2x32xf32>
    %127 = vector.extract_strided_slice %124 {offsets = [0, 64], sizes = [2, 32], strides = [1, 1]} : vector<2x128xf32> to vector<2x32xf32>
    %128 = vector.extract_strided_slice %123 {offsets = [0, 96], sizes = [2, 32], strides = [1, 1]} : vector<2x128xf32> to vector<2x32xf32>
    %129 = arith.mulf %126, %110 : vector<2x32xf32>
    %130 = arith.mulf %125, %127 : vector<2x32xf32>
    %131 = arith.addf %129, %130 : vector<2x32xf32>
    %132 = math.tanh %131 : vector<2x32xf32>
    %133 = arith.mulf %128, %132 : vector<2x32xf32>
    %c10 = arith.constant 10 : index
    %c0_39 = arith.constant 0 : index
    %134 = vector.load %arg14[%c10, %c0_39] : memref<16x32xf32, #tpu.memory_space<vmem>>, vector<2x32xf32>
    tpu.vector_store %arg14[%c10, %c0_39], %133 {strides = array<i32>} : memref<16x32xf32, #tpu.memory_space<vmem>>, vector<2x32xf32>,
    %135 = vector.extract_strided_slice %5 {offsets = [12, 0], sizes = [2, 128], strides = [1, 1]} : vector<16x128xf32> to vector<2x128xf32>
    %cst_40 = arith.constant dense<0.000000e+00> : vector<2x128xf32>
    %136 = tpu.matmul %133, %6, %cst_40 {dimension_numbers = #tpu.dot_dimension_numbers<[1], [0], [0], [1], [0, 0, 1, 1], [], []>} : vector<2x32xf32>, vector<32x128xf32>, vector<2x128xf32> -> vector<2x128xf32>
    %137 = arith.addf %135, %136 : vector<2x128xf32>
    %cst_41 = arith.constant 5.000000e-01 : f32
    %138 = vector.broadcast %cst_41 : f32 to vector<2x128xf32>
    %139 = arith.mulf %138, %137 : vector<2x128xf32>
    %140 = math.tanh %139 : vector<2x128xf32>
    %cst_42 = arith.constant 1.000000e+00 : f32
    %141 = vector.broadcast %cst_42 : f32 to vector<2x128xf32>
    %142 = arith.addf %140, %141 : vector<2x128xf32>
    %cst_43 = arith.constant 5.000000e-01 : f32
    %143 = vector.broadcast %cst_43 : f32 to vector<2x128xf32>
    %144 = arith.mulf %143, %142 : vector<2x128xf32>
    %145 = math.tanh %137 : vector<2x128xf32>
    %146 = vector.extract_strided_slice %144 {offsets = [0, 0], sizes = [2, 32], strides = [1, 1]} : vector<2x128xf32> to vector<2x32xf32>
    %147 = vector.extract_strided_slice %144 {offsets = [0, 32], sizes = [2, 32], strides = [1, 1]} : vector<2x128xf32> to vector<2x32xf32>
    %148 = vector.extract_strided_slice %145 {offsets = [0, 64], sizes = [2, 32], strides = [1, 1]} : vector<2x128xf32> to vector<2x32xf32>
    %149 = vector.extract_strided_slice %144 {offsets = [0, 96], sizes = [2, 32], strides = [1, 1]} : vector<2x128xf32> to vector<2x32xf32>
    %150 = arith.mulf %147, %131 : vector<2x32xf32>
    %151 = arith.mulf %146, %148 : vector<2x32xf32>
    %152 = arith.addf %150, %151 : vector<2x32xf32>
    %153 = math.tanh %152 : vector<2x32xf32>
    %154 = arith.mulf %149, %153 : vector<2x32xf32>
    %c12 = arith.constant 12 : index
    %c0_44 = arith.constant 0 : index
    %155 = vector.load %arg14[%c12, %c0_44] : memref<16x32xf32, #tpu.memory_space<vmem>>, vector<2x32xf32>
    tpu.vector_store %arg14[%c12, %c0_44], %154 {strides = array<i32>} : memref<16x32xf32, #tpu.memory_space<vmem>>, vector<2x32xf32>,
    %156 = vector.extract_strided_slice %5 {offsets = [14, 0], sizes = [2, 128], strides = [1, 1]} : vector<16x128xf32> to vector<2x128xf32>
    %cst_45 = arith.constant dense<0.000000e+00> : vector<2x128xf32>
    %157 = tpu.matmul %154, %6, %cst_45 {dimension_numbers = #tpu.dot_dimension_numbers<[1], [0], [0], [1], [0, 0, 1, 1], [], []>} : vector<2x32xf32>, vector<32x128xf32>, vector<2x128xf32> -> vector<2x128xf32>
    %158 = arith.addf %156, %157 : vector<2x128xf32>
    %cst_46 = arith.constant 5.000000e-01 : f32
    %159 = vector.broadcast %cst_46 : f32 to vector<2x128xf32>
    %160 = arith.mulf %159, %158 : vector<2x128xf32>
    %161 = math.tanh %160 : vector<2x128xf32>
    %cst_47 = arith.constant 1.000000e+00 : f32
    %162 = vector.broadcast %cst_47 : f32 to vector<2x128xf32>
    %163 = arith.addf %161, %162 : vector<2x128xf32>
    %cst_48 = arith.constant 5.000000e-01 : f32
    %164 = vector.broadcast %cst_48 : f32 to vector<2x128xf32>
    %165 = arith.mulf %164, %163 : vector<2x128xf32>
    %166 = math.tanh %158 : vector<2x128xf32>
    %167 = vector.extract_strided_slice %165 {offsets = [0, 0], sizes = [2, 32], strides = [1, 1]} : vector<2x128xf32> to vector<2x32xf32>
    %168 = vector.extract_strided_slice %165 {offsets = [0, 32], sizes = [2, 32], strides = [1, 1]} : vector<2x128xf32> to vector<2x32xf32>
    %169 = vector.extract_strided_slice %166 {offsets = [0, 64], sizes = [2, 32], strides = [1, 1]} : vector<2x128xf32> to vector<2x32xf32>
    %170 = vector.extract_strided_slice %165 {offsets = [0, 96], sizes = [2, 32], strides = [1, 1]} : vector<2x128xf32> to vector<2x32xf32>
    %171 = arith.mulf %168, %152 : vector<2x32xf32>
    %172 = arith.mulf %167, %169 : vector<2x32xf32>
    %173 = arith.addf %171, %172 : vector<2x32xf32>
    %174 = math.tanh %173 : vector<2x32xf32>
    %175 = arith.mulf %170, %174 : vector<2x32xf32>
    %c14 = arith.constant 14 : index
    %c0_49 = arith.constant 0 : index
    %176 = vector.load %arg14[%c14, %c0_49] : memref<16x32xf32, #tpu.memory_space<vmem>>, vector<2x32xf32>
    tpu.vector_store %arg14[%c14, %c0_49], %175 {strides = array<i32>} : memref<16x32xf32, #tpu.memory_space<vmem>>, vector<2x32xf32>,
    %c0_50 = arith.constant 0 : index
    %c0_51 = arith.constant 0 : index
    %177 = vector.load %arg14[%c0_50, %c0_51] : memref<16x32xf32, #tpu.memory_space<vmem>>, vector<16x32xf32>
    %c0_52 = arith.constant 0 : index
    %c0_53 = arith.constant 0 : index
    %178 = vector.load %arg4[%c0_52, %c0_53] : memref<32x32xf32, #tpu.memory_space<vmem>>, vector<32x32xf32>
    %cst_54 = arith.constant dense<0.000000e+00> : vector<16x32xf32>
    %179 = tpu.matmul %177, %178, %cst_54 {dimension_numbers = #tpu.dot_dimension_numbers<[1], [0], [0], [1], [0, 0, 1, 1], [], []>} : vector<16x32xf32>, vector<32x32xf32>, vector<16x32xf32> -> vector<16x32xf32>
    %c0_55 = arith.constant 0 : index
    %c0_56 = arith.constant 0 : index
    %180 = vector.load %arg5[%c0_55, %c0_56] : memref<1x32xf32, #tpu.memory_space<vmem>>, vector<1x32xf32>
    %181 = vector.broadcast %180 : vector<1x32xf32> to vector<16x32xf32>
    %182 = arith.addf %179, %181 : vector<16x32xf32>
    %183 = math.tanh %182 : vector<16x32xf32>
    %c0_57 = arith.constant 0 : index
    %c0_58 = arith.constant 0 : index
    %184 = vector.load %arg6[%c0_57, %c0_58] : memref<32x128xf32, #tpu.memory_space<vmem>>, vector<32x128xf32>
    %cst_59 = arith.constant dense<0.000000e+00> : vector<16x128xf32>
    %185 = tpu.matmul %183, %184, %cst_59 {dimension_numbers = #tpu.dot_dimension_numbers<[1], [0], [0], [1], [0, 0, 1, 1], [], []>} : vector<16x32xf32>, vector<32x128xf32>, vector<16x128xf32> -> vector<16x128xf32>
    %c0_60 = arith.constant 0 : index
    %c0_61 = arith.constant 0 : index
    %186 = vector.load %arg8[%c0_60, %c0_61] : memref<1x128xf32, #tpu.memory_space<vmem>>, vector<1x128xf32>
    %187 = vector.broadcast %186 : vector<1x128xf32> to vector<16x128xf32>
    %188 = arith.addf %185, %187 : vector<16x128xf32>
    %c0_62 = arith.constant 0 : index
    %c0_63 = arith.constant 0 : index
    %189 = vector.load %arg7[%c0_62, %c0_63] : memref<32x128xf32, #tpu.memory_space<vmem>>, vector<32x128xf32>
    %cst_64 = arith.constant 0.000000e+00 : f32
    %190 = vector.broadcast %cst_64 : f32 to vector<2x32xf32>
    %cst_65 = arith.constant 0.000000e+00 : f32
    %191 = vector.broadcast %cst_65 : f32 to vector<2x32xf32>
    %192 = vector.extract_strided_slice %188 {offsets = [0, 0], sizes = [2, 128], strides = [1, 1]} : vector<16x128xf32> to vector<2x128xf32>
    %cst_66 = arith.constant dense<0.000000e+00> : vector<2x128xf32>
    %193 = tpu.matmul %190, %189, %cst_66 {dimension_numbers = #tpu.dot_dimension_numbers<[1], [0], [0], [1], [0, 0, 1, 1], [], []>} : vector<2x32xf32>, vector<32x128xf32>, vector<2x128xf32> -> vector<2x128xf32>
    %194 = arith.addf %192, %193 : vector<2x128xf32>
    %cst_67 = arith.constant 5.000000e-01 : f32
    %195 = vector.broadcast %cst_67 : f32 to vector<2x128xf32>
    %196 = arith.mulf %195, %194 : vector<2x128xf32>
    %197 = math.tanh %196 : vector<2x128xf32>
    %cst_68 = arith.constant 1.000000e+00 : f32
    %198 = vector.broadcast %cst_68 : f32 to vector<2x128xf32>
    %199 = arith.addf %197, %198 : vector<2x128xf32>
    %cst_69 = arith.constant 5.000000e-01 : f32
    %200 = vector.broadcast %cst_69 : f32 to vector<2x128xf32>
    %201 = arith.mulf %200, %199 : vector<2x128xf32>
    %202 = math.tanh %194 : vector<2x128xf32>
    %203 = vector.extract_strided_slice %201 {offsets = [0, 0], sizes = [2, 32], strides = [1, 1]} : vector<2x128xf32> to vector<2x32xf32>
    %204 = vector.extract_strided_slice %201 {offsets = [0, 32], sizes = [2, 32], strides = [1, 1]} : vector<2x128xf32> to vector<2x32xf32>
    %205 = vector.extract_strided_slice %202 {offsets = [0, 64], sizes = [2, 32], strides = [1, 1]} : vector<2x128xf32> to vector<2x32xf32>
    %206 = vector.extract_strided_slice %201 {offsets = [0, 96], sizes = [2, 32], strides = [1, 1]} : vector<2x128xf32> to vector<2x32xf32>
    %207 = arith.mulf %204, %191 : vector<2x32xf32>
    %208 = arith.mulf %203, %205 : vector<2x32xf32>
    %209 = arith.addf %207, %208 : vector<2x32xf32>
    %210 = math.tanh %209 : vector<2x32xf32>
    %211 = arith.mulf %206, %210 : vector<2x32xf32>
    %212 = vector.extract_strided_slice %188 {offsets = [2, 0], sizes = [2, 128], strides = [1, 1]} : vector<16x128xf32> to vector<2x128xf32>
    %cst_70 = arith.constant dense<0.000000e+00> : vector<2x128xf32>
    %213 = tpu.matmul %211, %189, %cst_70 {dimension_numbers = #tpu.dot_dimension_numbers<[1], [0], [0], [1], [0, 0, 1, 1], [], []>} : vector<2x32xf32>, vector<32x128xf32>, vector<2x128xf32> -> vector<2x128xf32>
    %214 = arith.addf %212, %213 : vector<2x128xf32>
    %cst_71 = arith.constant 5.000000e-01 : f32
    %215 = vector.broadcast %cst_71 : f32 to vector<2x128xf32>
    %216 = arith.mulf %215, %214 : vector<2x128xf32>
    %217 = math.tanh %216 : vector<2x128xf32>
    %cst_72 = arith.constant 1.000000e+00 : f32
    %218 = vector.broadcast %cst_72 : f32 to vector<2x128xf32>
    %219 = arith.addf %217, %218 : vector<2x128xf32>
    %cst_73 = arith.constant 5.000000e-01 : f32
    %220 = vector.broadcast %cst_73 : f32 to vector<2x128xf32>
    %221 = arith.mulf %220, %219 : vector<2x128xf32>
    %222 = math.tanh %214 : vector<2x128xf32>
    %223 = vector.extract_strided_slice %221 {offsets = [0, 0], sizes = [2, 32], strides = [1, 1]} : vector<2x128xf32> to vector<2x32xf32>
    %224 = vector.extract_strided_slice %221 {offsets = [0, 32], sizes = [2, 32], strides = [1, 1]} : vector<2x128xf32> to vector<2x32xf32>
    %225 = vector.extract_strided_slice %222 {offsets = [0, 64], sizes = [2, 32], strides = [1, 1]} : vector<2x128xf32> to vector<2x32xf32>
    %226 = vector.extract_strided_slice %221 {offsets = [0, 96], sizes = [2, 32], strides = [1, 1]} : vector<2x128xf32> to vector<2x32xf32>
    %227 = arith.mulf %224, %209 : vector<2x32xf32>
    %228 = arith.mulf %223, %225 : vector<2x32xf32>
    %229 = arith.addf %227, %228 : vector<2x32xf32>
    %230 = math.tanh %229 : vector<2x32xf32>
    %231 = arith.mulf %226, %230 : vector<2x32xf32>
    %232 = vector.extract_strided_slice %188 {offsets = [4, 0], sizes = [2, 128], strides = [1, 1]} : vector<16x128xf32> to vector<2x128xf32>
    %cst_74 = arith.constant dense<0.000000e+00> : vector<2x128xf32>
    %233 = tpu.matmul %231, %189, %cst_74 {dimension_numbers = #tpu.dot_dimension_numbers<[1], [0], [0], [1], [0, 0, 1, 1], [], []>} : vector<2x32xf32>, vector<32x128xf32>, vector<2x128xf32> -> vector<2x128xf32>
    %234 = arith.addf %232, %233 : vector<2x128xf32>
    %cst_75 = arith.constant 5.000000e-01 : f32
    %235 = vector.broadcast %cst_75 : f32 to vector<2x128xf32>
    %236 = arith.mulf %235, %234 : vector<2x128xf32>
    %237 = math.tanh %236 : vector<2x128xf32>
    %cst_76 = arith.constant 1.000000e+00 : f32
    %238 = vector.broadcast %cst_76 : f32 to vector<2x128xf32>
    %239 = arith.addf %237, %238 : vector<2x128xf32>
    %cst_77 = arith.constant 5.000000e-01 : f32
    %240 = vector.broadcast %cst_77 : f32 to vector<2x128xf32>
    %241 = arith.mulf %240, %239 : vector<2x128xf32>
    %242 = math.tanh %234 : vector<2x128xf32>
    %243 = vector.extract_strided_slice %241 {offsets = [0, 0], sizes = [2, 32], strides = [1, 1]} : vector<2x128xf32> to vector<2x32xf32>
    %244 = vector.extract_strided_slice %241 {offsets = [0, 32], sizes = [2, 32], strides = [1, 1]} : vector<2x128xf32> to vector<2x32xf32>
    %245 = vector.extract_strided_slice %242 {offsets = [0, 64], sizes = [2, 32], strides = [1, 1]} : vector<2x128xf32> to vector<2x32xf32>
    %246 = vector.extract_strided_slice %241 {offsets = [0, 96], sizes = [2, 32], strides = [1, 1]} : vector<2x128xf32> to vector<2x32xf32>
    %247 = arith.mulf %244, %229 : vector<2x32xf32>
    %248 = arith.mulf %243, %245 : vector<2x32xf32>
    %249 = arith.addf %247, %248 : vector<2x32xf32>
    %250 = math.tanh %249 : vector<2x32xf32>
    %251 = arith.mulf %246, %250 : vector<2x32xf32>
    %252 = vector.extract_strided_slice %188 {offsets = [6, 0], sizes = [2, 128], strides = [1, 1]} : vector<16x128xf32> to vector<2x128xf32>
    %cst_78 = arith.constant dense<0.000000e+00> : vector<2x128xf32>
    %253 = tpu.matmul %251, %189, %cst_78 {dimension_numbers = #tpu.dot_dimension_numbers<[1], [0], [0], [1], [0, 0, 1, 1], [], []>} : vector<2x32xf32>, vector<32x128xf32>, vector<2x128xf32> -> vector<2x128xf32>
    %254 = arith.addf %252, %253 : vector<2x128xf32>
    %cst_79 = arith.constant 5.000000e-01 : f32
    %255 = vector.broadcast %cst_79 : f32 to vector<2x128xf32>
    %256 = arith.mulf %255, %254 : vector<2x128xf32>
    %257 = math.tanh %256 : vector<2x128xf32>
    %cst_80 = arith.constant 1.000000e+00 : f32
    %258 = vector.broadcast %cst_80 : f32 to vector<2x128xf32>
    %259 = arith.addf %257, %258 : vector<2x128xf32>
    %cst_81 = arith.constant 5.000000e-01 : f32
    %260 = vector.broadcast %cst_81 : f32 to vector<2x128xf32>
    %261 = arith.mulf %260, %259 : vector<2x128xf32>
    %262 = math.tanh %254 : vector<2x128xf32>
    %263 = vector.extract_strided_slice %261 {offsets = [0, 0], sizes = [2, 32], strides = [1, 1]} : vector<2x128xf32> to vector<2x32xf32>
    %264 = vector.extract_strided_slice %261 {offsets = [0, 32], sizes = [2, 32], strides = [1, 1]} : vector<2x128xf32> to vector<2x32xf32>
    %265 = vector.extract_strided_slice %262 {offsets = [0, 64], sizes = [2, 32], strides = [1, 1]} : vector<2x128xf32> to vector<2x32xf32>
    %266 = vector.extract_strided_slice %261 {offsets = [0, 96], sizes = [2, 32], strides = [1, 1]} : vector<2x128xf32> to vector<2x32xf32>
    %267 = arith.mulf %264, %249 : vector<2x32xf32>
    %268 = arith.mulf %263, %265 : vector<2x32xf32>
    %269 = arith.addf %267, %268 : vector<2x32xf32>
    %270 = math.tanh %269 : vector<2x32xf32>
    %271 = arith.mulf %266, %270 : vector<2x32xf32>
    %272 = vector.extract_strided_slice %188 {offsets = [8, 0], sizes = [2, 128], strides = [1, 1]} : vector<16x128xf32> to vector<2x128xf32>
    %cst_82 = arith.constant dense<0.000000e+00> : vector<2x128xf32>
    %273 = tpu.matmul %271, %189, %cst_82 {dimension_numbers = #tpu.dot_dimension_numbers<[1], [0], [0], [1], [0, 0, 1, 1], [], []>} : vector<2x32xf32>, vector<32x128xf32>, vector<2x128xf32> -> vector<2x128xf32>
    %274 = arith.addf %272, %273 : vector<2x128xf32>
    %cst_83 = arith.constant 5.000000e-01 : f32
    %275 = vector.broadcast %cst_83 : f32 to vector<2x128xf32>
    %276 = arith.mulf %275, %274 : vector<2x128xf32>
    %277 = math.tanh %276 : vector<2x128xf32>
    %cst_84 = arith.constant 1.000000e+00 : f32
    %278 = vector.broadcast %cst_84 : f32 to vector<2x128xf32>
    %279 = arith.addf %277, %278 : vector<2x128xf32>
    %cst_85 = arith.constant 5.000000e-01 : f32
    %280 = vector.broadcast %cst_85 : f32 to vector<2x128xf32>
    %281 = arith.mulf %280, %279 : vector<2x128xf32>
    %282 = math.tanh %274 : vector<2x128xf32>
    %283 = vector.extract_strided_slice %281 {offsets = [0, 0], sizes = [2, 32], strides = [1, 1]} : vector<2x128xf32> to vector<2x32xf32>
    %284 = vector.extract_strided_slice %281 {offsets = [0, 32], sizes = [2, 32], strides = [1, 1]} : vector<2x128xf32> to vector<2x32xf32>
    %285 = vector.extract_strided_slice %282 {offsets = [0, 64], sizes = [2, 32], strides = [1, 1]} : vector<2x128xf32> to vector<2x32xf32>
    %286 = vector.extract_strided_slice %281 {offsets = [0, 96], sizes = [2, 32], strides = [1, 1]} : vector<2x128xf32> to vector<2x32xf32>
    %287 = arith.mulf %284, %269 : vector<2x32xf32>
    %288 = arith.mulf %283, %285 : vector<2x32xf32>
    %289 = arith.addf %287, %288 : vector<2x32xf32>
    %290 = math.tanh %289 : vector<2x32xf32>
    %291 = arith.mulf %286, %290 : vector<2x32xf32>
    %292 = vector.extract_strided_slice %188 {offsets = [10, 0], sizes = [2, 128], strides = [1, 1]} : vector<16x128xf32> to vector<2x128xf32>
    %cst_86 = arith.constant dense<0.000000e+00> : vector<2x128xf32>
    %293 = tpu.matmul %291, %189, %cst_86 {dimension_numbers = #tpu.dot_dimension_numbers<[1], [0], [0], [1], [0, 0, 1, 1], [], []>} : vector<2x32xf32>, vector<32x128xf32>, vector<2x128xf32> -> vector<2x128xf32>
    %294 = arith.addf %292, %293 : vector<2x128xf32>
    %cst_87 = arith.constant 5.000000e-01 : f32
    %295 = vector.broadcast %cst_87 : f32 to vector<2x128xf32>
    %296 = arith.mulf %295, %294 : vector<2x128xf32>
    %297 = math.tanh %296 : vector<2x128xf32>
    %cst_88 = arith.constant 1.000000e+00 : f32
    %298 = vector.broadcast %cst_88 : f32 to vector<2x128xf32>
    %299 = arith.addf %297, %298 : vector<2x128xf32>
    %cst_89 = arith.constant 5.000000e-01 : f32
    %300 = vector.broadcast %cst_89 : f32 to vector<2x128xf32>
    %301 = arith.mulf %300, %299 : vector<2x128xf32>
    %302 = math.tanh %294 : vector<2x128xf32>
    %303 = vector.extract_strided_slice %301 {offsets = [0, 0], sizes = [2, 32], strides = [1, 1]} : vector<2x128xf32> to vector<2x32xf32>
    %304 = vector.extract_strided_slice %301 {offsets = [0, 32], sizes = [2, 32], strides = [1, 1]} : vector<2x128xf32> to vector<2x32xf32>
    %305 = vector.extract_strided_slice %302 {offsets = [0, 64], sizes = [2, 32], strides = [1, 1]} : vector<2x128xf32> to vector<2x32xf32>
    %306 = vector.extract_strided_slice %301 {offsets = [0, 96], sizes = [2, 32], strides = [1, 1]} : vector<2x128xf32> to vector<2x32xf32>
    %307 = arith.mulf %304, %289 : vector<2x32xf32>
    %308 = arith.mulf %303, %305 : vector<2x32xf32>
    %309 = arith.addf %307, %308 : vector<2x32xf32>
    %310 = math.tanh %309 : vector<2x32xf32>
    %311 = arith.mulf %306, %310 : vector<2x32xf32>
    %312 = vector.extract_strided_slice %188 {offsets = [12, 0], sizes = [2, 128], strides = [1, 1]} : vector<16x128xf32> to vector<2x128xf32>
    %cst_90 = arith.constant dense<0.000000e+00> : vector<2x128xf32>
    %313 = tpu.matmul %311, %189, %cst_90 {dimension_numbers = #tpu.dot_dimension_numbers<[1], [0], [0], [1], [0, 0, 1, 1], [], []>} : vector<2x32xf32>, vector<32x128xf32>, vector<2x128xf32> -> vector<2x128xf32>
    %314 = arith.addf %312, %313 : vector<2x128xf32>
    %cst_91 = arith.constant 5.000000e-01 : f32
    %315 = vector.broadcast %cst_91 : f32 to vector<2x128xf32>
    %316 = arith.mulf %315, %314 : vector<2x128xf32>
    %317 = math.tanh %316 : vector<2x128xf32>
    %cst_92 = arith.constant 1.000000e+00 : f32
    %318 = vector.broadcast %cst_92 : f32 to vector<2x128xf32>
    %319 = arith.addf %317, %318 : vector<2x128xf32>
    %cst_93 = arith.constant 5.000000e-01 : f32
    %320 = vector.broadcast %cst_93 : f32 to vector<2x128xf32>
    %321 = arith.mulf %320, %319 : vector<2x128xf32>
    %322 = math.tanh %314 : vector<2x128xf32>
    %323 = vector.extract_strided_slice %321 {offsets = [0, 0], sizes = [2, 32], strides = [1, 1]} : vector<2x128xf32> to vector<2x32xf32>
    %324 = vector.extract_strided_slice %321 {offsets = [0, 32], sizes = [2, 32], strides = [1, 1]} : vector<2x128xf32> to vector<2x32xf32>
    %325 = vector.extract_strided_slice %322 {offsets = [0, 64], sizes = [2, 32], strides = [1, 1]} : vector<2x128xf32> to vector<2x32xf32>
    %326 = vector.extract_strided_slice %321 {offsets = [0, 96], sizes = [2, 32], strides = [1, 1]} : vector<2x128xf32> to vector<2x32xf32>
    %327 = arith.mulf %324, %309 : vector<2x32xf32>
    %328 = arith.mulf %323, %325 : vector<2x32xf32>
    %329 = arith.addf %327, %328 : vector<2x32xf32>
    %330 = math.tanh %329 : vector<2x32xf32>
    %331 = arith.mulf %326, %330 : vector<2x32xf32>
    %332 = vector.extract_strided_slice %188 {offsets = [14, 0], sizes = [2, 128], strides = [1, 1]} : vector<16x128xf32> to vector<2x128xf32>
    %cst_94 = arith.constant dense<0.000000e+00> : vector<2x128xf32>
    %333 = tpu.matmul %331, %189, %cst_94 {dimension_numbers = #tpu.dot_dimension_numbers<[1], [0], [0], [1], [0, 0, 1, 1], [], []>} : vector<2x32xf32>, vector<32x128xf32>, vector<2x128xf32> -> vector<2x128xf32>
    %334 = arith.addf %332, %333 : vector<2x128xf32>
    %cst_95 = arith.constant 5.000000e-01 : f32
    %335 = vector.broadcast %cst_95 : f32 to vector<2x128xf32>
    %336 = arith.mulf %335, %334 : vector<2x128xf32>
    %337 = math.tanh %336 : vector<2x128xf32>
    %cst_96 = arith.constant 1.000000e+00 : f32
    %338 = vector.broadcast %cst_96 : f32 to vector<2x128xf32>
    %339 = arith.addf %337, %338 : vector<2x128xf32>
    %cst_97 = arith.constant 5.000000e-01 : f32
    %340 = vector.broadcast %cst_97 : f32 to vector<2x128xf32>
    %341 = arith.mulf %340, %339 : vector<2x128xf32>
    %342 = math.tanh %334 : vector<2x128xf32>
    %343 = vector.extract_strided_slice %341 {offsets = [0, 0], sizes = [2, 32], strides = [1, 1]} : vector<2x128xf32> to vector<2x32xf32>
    %344 = vector.extract_strided_slice %341 {offsets = [0, 32], sizes = [2, 32], strides = [1, 1]} : vector<2x128xf32> to vector<2x32xf32>
    %345 = vector.extract_strided_slice %342 {offsets = [0, 64], sizes = [2, 32], strides = [1, 1]} : vector<2x128xf32> to vector<2x32xf32>
    %346 = vector.extract_strided_slice %341 {offsets = [0, 96], sizes = [2, 32], strides = [1, 1]} : vector<2x128xf32> to vector<2x32xf32>
    %347 = arith.mulf %344, %329 : vector<2x32xf32>
    %348 = arith.mulf %343, %345 : vector<2x32xf32>
    %349 = arith.addf %347, %348 : vector<2x32xf32>
    %350 = math.tanh %349 : vector<2x32xf32>
    %351 = arith.mulf %346, %350 : vector<2x32xf32>
    %c0_98 = arith.constant 0 : index
    %c0_99 = arith.constant 0 : index
    %352 = vector.load %arg9[%c0_98, %c0_99] : memref<32x32xf32, #tpu.memory_space<vmem>>, vector<32x32xf32>
    %cst_100 = arith.constant dense<0.000000e+00> : vector<2x32xf32>
    %353 = tpu.matmul %351, %352, %cst_100 {dimension_numbers = #tpu.dot_dimension_numbers<[1], [0], [0], [1], [0, 0, 1, 1], [], []>} : vector<2x32xf32>, vector<32x32xf32>, vector<2x32xf32> -> vector<2x32xf32>
    %c0_101 = arith.constant 0 : index
    %c0_102 = arith.constant 0 : index
    %354 = vector.load %arg10[%c0_101, %c0_102] : memref<1x32xf32, #tpu.memory_space<vmem>>, vector<1x32xf32>
    %355 = vector.broadcast %354 : vector<1x32xf32> to vector<2x32xf32>
    %356 = arith.addf %353, %355 : vector<2x32xf32>
    %357 = math.tanh %356 : vector<2x32xf32>
    %358 = vector.extract_strided_slice %357 {offsets = [0, 0], sizes = [1, 32], strides = [1, 1]} : vector<2x32xf32> to vector<1x32xf32>
    %c0_103 = arith.constant 0 : index
    %c0_104 = arith.constant 0 : index
    %359 = vector.load %arg11[%c0_103, %c0_104] : memref<1x32xf32, #tpu.memory_space<vmem>>, vector<1x32xf32>
    %360 = arith.mulf %358, %359 : vector<1x32xf32>
    %cst_105 = arith.constant dense<0.000000e+00> : vector<1xf32>
    %361 = vector.multi_reduction <add>, %360, %cst_105 [1] : vector<1x32xf32> to vector<1xf32>
    %362 = vector.shape_cast %361 : vector<1xf32> to vector<1x1xf32>
    %c0_106 = arith.constant 0 : index
    %c0_107 = arith.constant 0 : index
    %363 = vector.load %arg12[%c0_106, %c0_107] : memref<1x1xf32, #tpu.memory_space<vmem>>, vector<1x1xf32>
    %364 = arith.addf %362, %363 : vector<1x1xf32>
    %cst_108 = arith.constant 5.000000e-01 : f32
    %365 = vector.broadcast %cst_108 : f32 to vector<1x1xf32>
    %366 = arith.mulf %365, %364 : vector<1x1xf32>
    %367 = math.tanh %366 : vector<1x1xf32>
    %cst_109 = arith.constant 1.000000e+00 : f32
    %368 = vector.broadcast %cst_109 : f32 to vector<1x1xf32>
    %369 = arith.addf %367, %368 : vector<1x1xf32>
    %cst_110 = arith.constant 5.000000e-01 : f32
    %370 = vector.broadcast %cst_110 : f32 to vector<1x1xf32>
    %371 = arith.mulf %370, %369 : vector<1x1xf32>
    %c0_111 = arith.constant 0 : index
    %c0_112 = arith.constant 0 : index
    %372 = vector.load %arg13[%c0_111, %c0_112] : memref<1x1xf32, #tpu.memory_space<vmem>>, vector<1x1xf32>
    tpu.vector_store %arg13[%c0_111, %c0_112], %371 {strides = array<i32>} : memref<1x1xf32, #tpu.memory_space<vmem>>, vector<1x1xf32>,
    return
  }
}

</mosaic_0001>

<bundles_post_ra>
// kernel: encoder_classifier_forward.1
= control target key start
LH: loop header
LB: loop body
LE: loop exit
PB: predicated region body
PF: predicated region fallthrough
CT: control target
= control target key end

     0   :  { %s3280_s0 = inlined_call_operand.vmem [shape: f32[16,40], index: 0, kind: input, shape index: {}]   ;;  %s3281_s1 = inlined_call_operand.vmem [shape: f32[40,128], index: 1, kind: input, shape index: {}]   ;;  %s3282_s2 = inlined_call_operand.hbm [shape: f32[32,128], index: 2, kind: input, shape index: {}]   ;;  %s3283_s3 = inlined_call_operand.vmem [shape: f32[1,128], index: 3, kind: input, shape index: {}]   ;;  %s3284_s4 = inlined_call_operand.hbm [shape: f32[32,32], index: 4, kind: input, shape index: {}]   ;;  %s3285_s5 = inlined_call_operand.vmem [shape: f32[1,32], index: 5, kind: input, shape index: {}]   ;;  %s3286_s6 = inlined_call_operand.hbm [shape: f32[32,128], index: 6, kind: input, shape index: {}]   ;;  %s3287_s7 = inlined_call_operand.hbm [shape: f32[32,128], index: 7, kind: input, shape index: {}]   ;;  %s3288_s8 = inlined_call_operand.vmem [shape: f32[1,128], index: 8, kind: input, shape index: {}]   ;;  %s3289_s9 = inlined_call_operand.hbm [shape: f32[32,32], index: 9, kind: input, shape index: {}]   ;;  %s3290_s10 = inlined_call_operand.vmem [shape: f32[1,32], index: 10, kind: input, shape index: {}]   ;;  %s3291_s11 = inlined_call_operand.vmem [shape: f32[1,32], index: 11, kind: input, shape index: {}]   ;;  %s3292_s12 = inlined_call_operand.<no memory space> [shape: f32[1,1], index: 12, kind: input, shape index: {}]   ;;  %s3293_s13 = inlined_call_operand.hbm [shape: f32[1,1], index: 13, kind: output, shape index: {}]  }
   0x1   :  { %v18_v0 = vstv %s3292_s12 }
   0x2   :  { %19 = vst [vmem:[#allocation3] sm:$0x1] %v18_v0 }
   0x3   :  { %20 = vsyncpa [#allocation5], 0 }
   0x4   :  { %21 = vsyncpa [#allocation8], 0 }
   0x5   :  { %22 = vsyncpa [#allocation11], 0 }
   0x6   :  { %23 = vsyncpa [#allocation6], 0  ;;  %s2804_s27 = smov [#allocation7]   ;;  %s2805_s29 = smov [#allocation10]  }
   0x7   :  { %s47_s28 = sshll.u32 %s2804_s27, 4  ;;  %s73_s30 = sshll.u32 %s2805_s29, 4  ;;  %s48_s28 = int_to_ptr.vmem [resolvable:$true] %s47_s28  ;;  %s74_s30 = int_to_ptr.vmem [resolvable:$true] %s73_s30 }
   0x8   :  { %s2684_s14 = scalar_lea.vmem %s48_s28, 512  ;;  %p2689_p1 = scmp.lt.s32.totalorder %s48_s28, %s48_s28 }
   0x9   :  { %p2685_p0 = scmp.ne.s32.totalorder %s48_s28, %s2684_s14  ;;  %p2690_p2 = scmp.lt.s32.totalorder %s2684_s14, %s2684_s14 }
   0xb   :  { %p2691_p3 = por %p2690_p2, %p2689_p1 }
   0xd   :  { %p2692_p4 = pnand %p2691_p3, %p2685_p0 }
   0xf   :  { %2695 = shalt.err (!%p2692_p4)
}
  0x10   :  { %s2806_s15 = smov 128   ;;  %s2807_s12 = smov 8  }
  0x11   :  { %53 = dma.hbm_to_vmem [thread:$0]  %s3284_s4, 512, %s48_s28, [#allocation8], %s2806_s15, %s2806_s15, %s2807_s12  }
  0x12   :  { %s2704_s18 = scalar_lea.vmem %s74_s30, 512  ;;  %p2709_p6 = scmp.lt.s32.totalorder %s74_s30, %s74_s30 }
  0x13   :  { %p2705_p5 = scmp.ne.s32.totalorder %s74_s30, %s2704_s18  ;;  %p2710_p7 = scmp.lt.s32.totalorder %s2704_s18, %s2704_s18 }
  0x15   :  { %p2711_p8 = por %p2710_p7, %p2709_p6 }
  0x17   :  { %p2712_p9 = pnand %p2711_p8, %p2705_p5 }
  0x19   :  { %2715 = shalt.err (!%p2712_p9)
}
  0x1a   :  { %79 = dma.hbm_to_vmem [thread:$0]  %s3287_s7, 512, %s74_s30, [#allocation11], %s2806_s15, %s2806_s15, %s2807_s12  }
  0x1b   :  { %s2808_s21 = smov [#allocation4]   ;;  %s2809_s23 = smov [#allocation9]  }
  0x1c   :  { %s33_s22 = sshll.u32 %s2808_s21, 4  ;;  %s61_s24 = sshll.u32 %s2809_s23, 4  ;;  %s34_s22 = int_to_ptr.vmem [resolvable:$true] %s33_s22  ;;  %s62_s24 = int_to_ptr.vmem [resolvable:$true] %s61_s24 }
  0x1d   :  { %s2724_s4 = scalar_lea.vmem %s34_s22, 512  ;;  %p2729_p11 = scmp.lt.s32.totalorder %s34_s22, %s34_s22 }
  0x1e   :  { %p2725_p10 = scmp.ne.s32.totalorder %s34_s22, %s2724_s4  ;;  %p2730_p12 = scmp.lt.s32.totalorder %s2724_s4, %s2724_s4 }
  0x20   :  { %p2731_p13 = por %p2730_p12, %p2729_p11 }
  0x22   :  { %p2732_p0 = pnand %p2731_p13, %p2725_p10 }
  0x24   :  { %2735 = shalt.err (!%p2732_p0)
}
  0x25   :  { %39 = dma.hbm_to_vmem [thread:$0]  %s3282_s2, 512, %s34_s22, [#allocation5], %s2806_s15, %s2806_s15, %s2807_s12  }
  0x26   :  { %s2744_s7 = scalar_lea.vmem %s62_s24, 512  ;;  %p2749_p2 = scmp.lt.s32.totalorder %s62_s24, %s62_s24 }
  0x27   :  { %p2745_p1 = scmp.ne.s32.totalorder %s62_s24, %s2744_s7  ;;  %p2750_p3 = scmp.lt.s32.totalorder %s2744_s7, %s2744_s7 }
  0x29   :  { %p2751_p4 = por %p2750_p3, %p2749_p2 }
  0x2b   :  { %p2752_p5 = pnand %p2751_p4, %p2745_p1 }
  0x2d   :  { %2755 = shalt.err (!%p2752_p5)
}
  0x2e   :  { %67 = dma.hbm_to_vmem [thread:$0]  %s3286_s6, 512, %s62_s24, [#allocation8], %s2806_s15, %s2806_s15, %s2807_s12  }
  0x2f   :  { %s2810_s29 = smov [#allocation12]  }
  0x30   :  { %s87_s30 = sshll.u32 %s2810_s29, 4  ;;  %s88_s30 = int_to_ptr.vmem [resolvable:$true] %s87_s30 }
  0x31   :  { %s2764_s14 = scalar_lea.vmem %s88_s30, 512  ;;  %p2769_p7 = scmp.lt.s32.totalorder %s88_s30, %s88_s30 }
  0x32   :  { %p2765_p6 = scmp.ne.s32.totalorder %s88_s30, %s2764_s14  ;;  %p2770_p8 = scmp.lt.s32.totalorder %s2764_s14, %s2764_s14 }
  0x34   :  { %p2771_p9 = por %p2770_p8, %p2769_p7 }
  0x36   :  { %p2772_p10 = pnand %p2771_p9, %p2765_p6 }
  0x38   :  { %2775 = shalt.err (!%p2772_p10)
}
  0x39   :  { %93 = dma.hbm_to_vmem [thread:$0]  %s3289_s9, 512, %s88_s30, [#allocation11], %s2806_s15, %s2806_s15, %s2807_s12  }
  0x3a   :  { %2796 = dma.done.wait [#allocation5], 512  }
  0x3b   :  { %2797 = vsyncadd [#allocation5], 4294966784 }
  0x3c   :  { %2798 = dma.done.wait [#allocation8], 1024  }
  0x3d   :  { %2799 = vsyncadd [#allocation8], 4294966272 }
  0x3e   :  { %2800 = dma.done.wait [#allocation11], 1024  }
  0x3f   :  { %2801 = vsyncadd [#allocation11], 4294966272  ;;  %v2811_v1 = vmov 0.0   ;;  %vm2812_vm0 = vmmov 0   ;;  %v121_v2 = vld [vmem:[%s3281_s1 + $0x20] sm:$0xff]  ;;  %v120_v3 = vld [vmem:[%s3281_s1 + $0x18] sm:$0xff] }
  0x40   :  { %2351 = vmatprep.subr.mxu1 %v2811_v1  ;;  %2359 = vmatprep.mubr.msk.f32.mxu1 %vm2812_vm0, %v2811_v1  ;;  %v2928_v4 = vld [vmem:[#allocation4 + $0x18] sm:$0xff]  ;;  %v2930_v5 = vld [vmem:[#allocation4 + $0x10] sm:$0xff]  ;;  %vm129_vm1 = vcmask 326656   ;;  %v2944_v9 = vld [vmem:[#allocation4 + $0x8] sm:$0xff]  ;;  %s2813_s26 = smov 64   ;;  %vm316_vm2 = vcmask 254976  }
  0x41   :  { %2338 = vmatprep.subr.mxu0 %v121_v2  ;;  %v119_v6 = vld [vmem:[%s3281_s1 + $0x10] sm:$0xff]  ;;  %2352 = vmatpush3.msra.mxu1 %v2928_v4  ;;  %v115_v7 = vld [vmem:[%s3280_s0] sm:$0xff]  ;;  %v118_v8 = vld [vmem:[%s3281_s1 + $0x8] sm:$0xff]  ;;  %vm215_vm3 = vcmask 261120   ;;  %vm423_vm4 = vcmask 257026   ;;  %vm643_vm5 = vcmask 261126  }
  0x42   :  { %2339 = vmatpush3.msra.mxu0 %v121_v2  ;;  %2353 = vmatprep.subr.mxu1 %v2811_v1  ;;  %v117_v10 = vld [vmem:[%s3281_s1] sm:$0xff]  ;;  %v2951_v11 = vld [vmem:[#allocation4] sm:$0xff]  ;;  %v116_v12 = vld [vmem:[%s3280_s0 + $0x8] sm:$0xff]  ;;  %vm533_vm6 = vcmask 259076   ;;  %vm2180_vm7 = vcmask 253952   ;;  %vm2190_vm8 = vcmask 0  }
  0x43   :  { %2340 = vmatprep.subr.mxu0 %v120_v3  ;;  %2354 = vmatpush3.msra.mxu1 %v2930_v5  ;;  %v2209_v13 = vld [vmem:[%s3283_s3] ss:$0 sm:$0xff]  ;;  %s2814_s3 = smov 32  }
  0x44   :  { %2341 = vmatpush3.msra.mxu0 %v120_v3  ;;  %2355 = vmatprep.subr.mxu1 %v2811_v1 }
  0x45   :  { %2342 = vmatprep.subr.mxu0 %v119_v6  ;;  %2348 = vmatprep.mubr.msk.f32.mxu0 %vm129_vm1, %v115_v7 }
  0x46   :  { %2343 = vmatpush3.msra.mxu0 %v119_v6  ;;  %2356 = vmatpush3.msra.mxu1 %v2944_v9 }
  0x47   :  { %2344 = vmatprep.subr.mxu0 %v118_v8  ;;  %2357 = vmatprep.subr.mxu1 %v2811_v1 }
  0x48   :  { %2345 = vmatpush3.msra.mxu0 %v118_v8  ;;  %2358 = vmatpush3.msra.mxu1 %v2951_v11 }
  0x49   :  { %2346 = vmatprep.subr.mxu0 %v117_v10  ;;  %2360 = vmatmul.mubr.f32.vlgmr.msra.gmra.mxu1 %v2811_v1 }
  0x4a   :  { %2347 = vmatpush3.msra.mxu0 %v117_v10  ;;  %2362 = vmatprep.subr.mxu1 %v2811_v1 }
  0x4b   :  { %2349 = vmatmul.mubr.msk.f32.vlgmr.msra.gmra.mxu0 %vm129_vm1, %v116_v12  ;;  %2363 = vmatpush3.msra.mxu1 %v2928_v4 }
  0x4c   :  { %2370 = vmatprep.mubr.msk.f32.mxu1 %vm2812_vm0, %v2811_v1  ;;  %2364 = vmatprep.subr.mxu1 %v2811_v1 }
  0x4d   :  { %2373 = vmatprep.subr.mxu0 %v2811_v1  ;;  %2365 = vmatpush3.msra.mxu1 %v2930_v5 }
  0x4e   :  { %2374 = vmatpush3.msra.mxu0 %v2928_v4  ;;  %2366 = vmatprep.subr.mxu1 %v2811_v1 }
  0x4f   :  { %2375 = vmatprep.subr.mxu0 %v2811_v1  ;;  %2367 = vmatpush3.msra.mxu1 %v2944_v9 }
  0x50   :  { %2376 = vmatpush3.msra.mxu0 %v2930_v5  ;;  %2368 = vmatprep.subr.mxu1 %v2811_v1 }
  0x51   :  { %2377 = vmatprep.subr.mxu0 %v2811_v1  ;;  %2369 = vmatpush3.msra.mxu1 %v2951_v11 }
  0x52   :  { %2378 = vmatpush3.msra.mxu0 %v2944_v9  ;;  %2381 = vmatprep.mubr.msk.f32.mxu0 %vm2812_vm0, %v2811_v1 }
  0x53   :  { %2379 = vmatprep.subr.mxu0 %v2811_v1  ;;  %2384 = vmatprep.subr.mxu1 %v2811_v1 }
  0x54   :  { %2380 = vmatpush3.msra.mxu0 %v2951_v11 }
  0x55   :  { %2395 = vmatprep.subr.mxu0 %v2811_v1 }
 0x109   :  { %v285_v14 = vpop.f32.mrf.mxu1 }
 0x10b   :  { %v2350_v15 = vpop.f32.mrf.mxu0  ;;  %v2361_v17 = vpop.f32.mrf.mxu1 }
 0x10c   :  { %v2986_v16 = vadd.f32 %v2350_v15, %v2209_v13 }
 0x10d   :  { %v202_v18 = vpop.f32.mrf.mxu0 }
 0x10e   :  { %v2988_v19 = vadd.f32 %v2209_v13, %v202_v18 }
 0x110   :  { %v289_v20 = vadd.f32 %v285_v14, %v2988_v19 }
 0x112   :  { %2572 = vtanh.f32 %v289_v20  ;;  %v290_v22 = vmul.f32 0.5, %v289_v20 }
 0x114   :  { %2574 = vtanh.f32 %v290_v22 }
 0x11f   :  { %v2573_v21 = vpop.eup %2572 }
 0x120   :  { %297 = vrot.lane.b32.xlu0 %v2573_v21, %s2813_s26 }
 0x121   :  { %v2575_v23 = vpop.eup %2574 }
 0x122   :  { %v292_v24 = vadd.f32 1.0, %v2575_v23 }
 0x124   :  { %v293_v25 = vmul.f32 0.5, %v292_v24 }
 0x126   :  { %v295_v28 = vmul.f32 0.0, %v293_v25 }
 0x192   :  { %v298_v26 = vpop.permute.xlu0 %297 }
 0x193   :  { %v300_v27 = vmul.f32 %v298_v26, %v293_v25 }
 0x195   :  { %302 = vrot.lane.b32.xlu0 %v300_v27, %s2814_s3 }
 0x207   :  { %v303_v29 = vpop.permute.xlu0 %302 }
 0x208   :  { %v305_v30 = vadd.f32 %v303_v29, %v295_v28 }
 0x20a   :  { %2576 = vtanh.f32 %v305_v30  ;;  %v400_v46 = vrot.slane %v305_v30, 6 }
 0x217   :  { %v2577_v31 = vpop.eup %2576 }
 0x218   :  { %308 = vrot.lane.b32.xlu1 %v2577_v31, %s2813_s26 }
 0x28a   :  { %v309_v32 = vpop.permute.xlu1 %308 }
 0x28b   :  { %v311_v33 = vmul.f32 %v309_v32, %v293_v25 }
 0x28d   :  { %313 = vrot.lane.b32.xlu1 %v311_v33, %s2814_s3 }
 0x2ff   :  { %v314_v34 = vpop.permute.xlu1 %313 }
 0x300   :  { %317 = vst.msk [vmem:[#allocation2] sm:$0x3] %vm316_vm2, %v314_v34  ;;  %2371 = vmatmul.mubr.msk.f32.vlgmr.msra.gmra.mxu1 %vm215_vm3, %v314_v34 }
 0x301   :  { %2385 = vmatpush3.msra.mxu1 %v2928_v4  ;;  %2392 = vmatprep.mubr.msk.f32.mxu1 %vm2812_vm0, %v2811_v1 }
 0x302   :  { %2386 = vmatprep.subr.mxu1 %v2811_v1 }
 0x303   :  { %2387 = vmatpush3.msra.mxu1 %v2930_v5 }
 0x304   :  { %2388 = vmatprep.subr.mxu1 %v2811_v1 }
 0x305   :  { %2389 = vmatpush3.msra.mxu1 %v2944_v9 }
 0x306   :  { %2390 = vmatprep.subr.mxu1 %v2811_v1 }
 0x307   :  { %2391 = vmatpush3.msra.mxu1 %v2951_v11 }
 0x308   :  { %2406 = vmatprep.subr.mxu1 %v2811_v1 }
 0x3c0   :  { %v386_v35 = vpop.f32.mrf.mxu1 }
 0x3c1   :  { %v391_v36 = vrot.slane %v386_v35, 6 }
 0x3c2   :  { %v2372_v37 = vpop.f32.mrf.mxu1 }
 0x3c3   :  { %v393_v38 = vadd.f32 %v391_v36, %v2988_v19 }
 0x3c5   :  { %2578 = vtanh.f32 %v393_v38  ;;  %v394_v40 = vmul.f32 0.5, %v393_v38 }
 0x3c7   :  { %2580 = vtanh.f32 %v394_v40 }
 0x3d2   :  { %v2579_v39 = vpop.eup %2578 }
 0x3d3   :  { %404 = vrot.lane.b32.xlu0 %v2579_v39, %s2813_s26 }
 0x3d4   :  { %v2581_v41 = vpop.eup %2580 }
 0x3d5   :  { %v396_v42 = vadd.f32 1.0, %v2581_v41 }
 0x3d7   :  { %v397_v43 = vmul.f32 0.5, %v396_v42 }
 0x3d9   :  { %v402_v47 = vmul.f32 %v400_v46, %v397_v43 }
 0x445   :  { %v405_v44 = vpop.permute.xlu0 %404 }
 0x446   :  { %v407_v45 = vmul.f32 %v405_v44, %v397_v43 }
 0x448   :  { %409 = vrot.lane.b32.xlu1 %v407_v45, %s2814_s3 }
 0x4ba   :  { %v410_v48 = vpop.permute.xlu1 %409 }
 0x4bb   :  { %v412_v49 = vadd.f32 %v410_v48, %v402_v47 }
 0x4bd   :  { %2582 = vtanh.f32 %v412_v49  ;;  %v510_v3 = vrot.slane %v412_v49, 6 }
 0x4ca   :  { %v2583_v50 = vpop.eup %2582 }
 0x4cb   :  { %415 = vrot.lane.b32.xlu0 %v2583_v50, %s2813_s26 }
 0x53d   :  { %v416_v51 = vpop.permute.xlu0 %415 }
 0x53e   :  { %v3011_v52 = vmul.f32 %v416_v51, %v397_v43 }
 0x540   :  { %v425_v53 = vrot.slane %v3011_v52, 2 }
 0x542   :  { %426 = vrot.lane.b32.xlu1 %v425_v53, %s2814_s3 }
 0x5b4   :  { %v427_v54 = vpop.permute.xlu1 %426 }
 0x5b5   :  { %2382 = vmatmul.mubr.msk.f32.vlgmr.msra.gmra.mxu0 %vm215_vm3, %v427_v54 }
 0x5b6   :  { %2396 = vmatpush3.msra.mxu0 %v2928_v4  ;;  %2403 = vmatprep.mubr.msk.f32.mxu0 %vm2812_vm0, %v2811_v1 }
 0x5b7   :  { %2397 = vmatprep.subr.mxu0 %v2811_v1 }
 0x5b8   :  { %2398 = vmatpush3.msra.mxu0 %v2930_v5 }
 0x5b9   :  { %2399 = vmatprep.subr.mxu0 %v2811_v1 }
 0x5ba   :  { %2400 = vmatpush3.msra.mxu0 %v2944_v9 }
 0x5bb   :  { %2401 = vmatprep.subr.mxu0 %v2811_v1 }
 0x5bc   :  { %2402 = vmatpush3.msra.mxu0 %v2951_v11 }
 0x5bd   :  { %2417 = vmatprep.subr.mxu0 %v2811_v1 }
 0x675   :  { %v496_v55 = vpop.f32.mrf.mxu0 }
 0x676   :  { %v501_v56 = vrot.slane %v496_v55, 4 }
 0x677   :  { %v2383_v57 = vpop.f32.mrf.mxu0 }
 0x678   :  { %v503_v58 = vadd.f32 %v501_v56, %v2988_v19 }
 0x67a   :  { %2584 = vtanh.f32 %v503_v58  ;;  %v504_v60 = vmul.f32 0.5, %v503_v58 }
 0x67c   :  { %2586 = vtanh.f32 %v504_v60 }
 0x687   :  { %v2585_v59 = vpop.eup %2584 }
 0x688   :  { %514 = vrot.lane.b32.xlu0 %v2585_v59, %s2813_s26 }
 0x689   :  { %v2587_v61 = vpop.eup %2586 }
 0x68a   :  { %v506_v62 = vadd.f32 1.0, %v2587_v61 }
 0x68c   :  { %v507_v63 = vmul.f32 0.5, %v506_v62 }
 0x68e   :  { %v512_v6 = vmul.f32 %v510_v3, %v507_v63 }
 0x6fa   :  { %v515_v0 = vpop.permute.xlu0 %514 }
 0x6fb   :  { %v517_v2 = vmul.f32 %v515_v0, %v507_v63 }
 0x6fd   :  { %519 = vrot.lane.b32.xlu1 %v517_v2, %s2814_s3 }
 0x76f   :  { %v520_v7 = vpop.permute.xlu1 %519 }
 0x770   :  { %v522_v8 = vadd.f32 %v520_v7, %v512_v6 }
 0x772   :  { %2588 = vtanh.f32 %v522_v8  ;;  %v620_v29 = vrot.slane %v522_v8, 6 }
 0x77f   :  { %v2589_v10 = vpop.eup %2588 }
 0x780   :  { %525 = vrot.lane.b32.xlu0 %v2589_v10, %s2813_s26 }
 0x7f2   :  { %v526_v12 = vpop.permute.xlu0 %525 }
 0x7f3   :  { %v3030_v13 = vmul.f32 %v526_v12, %v507_v63 }
 0x7f5   :  { %v535_v14 = vrot.slane %v3030_v13, 4 }
 0x7f7   :  { %536 = vrot.lane.b32.xlu1 %v535_v14, %s2814_s3 }
 0x869   :  { %v537_v15 = vpop.permute.xlu1 %536 }
 0x86a   :  { %2393 = vmatmul.mubr.msk.f32.vlgmr.msra.gmra.mxu1 %vm215_vm3, %v537_v15 }
 0x86b   :  { %2407 = vmatpush3.msra.mxu1 %v2928_v4  ;;  %2414 = vmatprep.mubr.msk.f32.mxu1 %vm2812_vm0, %v2811_v1 }
 0x86c   :  { %2408 = vmatprep.subr.mxu1 %v2811_v1 }
 0x86d   :  { %2409 = vmatpush3.msra.mxu1 %v2930_v5 }
 0x86e   :  { %2410 = vmatprep.subr.mxu1 %v2811_v1 }
 0x86f   :  { %2411 = vmatpush3.msra.mxu1 %v2944_v9 }
 0x870   :  { %2412 = vmatprep.subr.mxu1 %v2811_v1 }
 0x871   :  { %2413 = vmatpush3.msra.mxu1 %v2951_v11 }
 0x872   :  { %2428 = vmatprep.subr.mxu1 %v2811_v1 }
 0x92a   :  { %v606_v17 = vpop.f32.mrf.mxu1 }
 0x92b   :  { %v611_v18 = vrot.slane %v606_v17, 2 }
 0x92c   :  { %v2394_v20 = vpop.f32.mrf.mxu1 }
 0x92d   :  { %v613_v21 = vadd.f32 %v611_v18, %v2988_v19 }
 0x92f   :  { %2590 = vtanh.f32 %v613_v21  ;;  %v614_v23 = vmul.f32 0.5, %v613_v21 }
 0x931   :  { %2592 = vtanh.f32 %v614_v23 }
 0x93c   :  { %v2591_v22 = vpop.eup %2590 }
 0x93d   :  { %624 = vrot.lane.b32.xlu0 %v2591_v22, %s2813_s26 }
 0x93e   :  { %v2593_v24 = vpop.eup %2592 }
 0x93f   :  { %v616_v25 = vadd.f32 1.0, %v2593_v24 }
 0x941   :  { %v617_v26 = vmul.f32 0.5, %v616_v25 }
 0x943   :  { %v622_v30 = vmul.f32 %v620_v29, %v617_v26 }
 0x9af   :  { %v625_v27 = vpop.permute.xlu0 %624 }
 0x9b0   :  { %v627_v28 = vmul.f32 %v625_v27, %v617_v26 }
 0x9b2   :  { %629 = vrot.lane.b32.xlu1 %v627_v28, %s2814_s3 }
 0xa24   :  { %v630_v31 = vpop.permute.xlu1 %629 }
 0xa25   :  { %v632_v32 = vadd.f32 %v630_v31, %v622_v30 }
 0xa27   :  { %2594 = vtanh.f32 %v632_v32  ;;  %v727_v47 = vrot.slane %v632_v32, 6 }
 0xa34   :  { %v2595_v33 = vpop.eup %2594 }
 0xa35   :  { %635 = vrot.lane.b32.xlu0 %v2595_v33, %s2813_s26 }
 0xaa7   :  { %v636_v19 = vpop.permute.xlu0 %635 }
 0xaa8   :  { %v3049_v34 = vmul.f32 %v636_v19, %v617_v26 }
 0xaaa   :  { %v645_v35 = vrot.slane %v3049_v34, 6 }
 0xaac   :  { %646 = vrot.lane.b32.xlu1 %v645_v35, %s2814_s3 }
 0xb1e   :  { %v647_v36 = vpop.permute.xlu1 %646 }
 0xb1f   :  { %2404 = vmatmul.mubr.msk.f32.vlgmr.msra.gmra.mxu0 %vm215_vm3, %v647_v36 }
 0xb20   :  { %2418 = vmatpush3.msra.mxu0 %v2928_v4  ;;  %2425 = vmatprep.mubr.msk.f32.mxu0 %vm2812_vm0, %v2811_v1 }
 0xb21   :  { %2419 = vmatprep.subr.mxu0 %v2811_v1 }
 0xb22   :  { %2420 = vmatpush3.msra.mxu0 %v2930_v5 }
 0xb23   :  { %2421 = vmatprep.subr.mxu0 %v2811_v1 }
 0xb24   :  { %2422 = vmatpush3.msra.mxu0 %v2944_v9 }
 0xb25   :  { %2423 = vmatprep.subr.mxu0 %v2811_v1 }
 0xb26   :  { %2424 = vmatpush3.msra.mxu0 %v2951_v11 }
 0xbdf   :  { %v716_v37 = vpop.f32.mrf.mxu0 }
 0xbe0   :  { %v720_v38 = vadd.f32 %v716_v37, %v2986_v16 }
 0xbe1   :  { %v2405_v39 = vpop.f32.mrf.mxu0 }
 0xbe2   :  { %2596 = vtanh.f32 %v720_v38  ;;  %v721_v41 = vmul.f32 0.5, %v720_v38 }
 0xbe4   :  { %2598 = vtanh.f32 %v721_v41 }
 0xbef   :  { %v2597_v40 = vpop.eup %2596 }
 0xbf0   :  { %731 = vrot.lane.b32.xlu0 %v2597_v40, %s2813_s26 }
 0xbf1   :  { %v2599_v42 = vpop.eup %2598 }
 0xbf2   :  { %v723_v43 = vadd.f32 1.0, %v2599_v42 }
 0xbf4   :  { %v724_v44 = vmul.f32 0.5, %v723_v43 }
 0xbf6   :  { %v729_v48 = vmul.f32 %v727_v47, %v724_v44 }
 0xc62   :  { %v732_v45 = vpop.permute.xlu0 %731 }
 0xc63   :  { %v734_v46 = vmul.f32 %v732_v45, %v724_v44 }
 0xc65   :  { %736 = vrot.lane.b32.xlu1 %v734_v46, %s2814_s3 }
 0xcd7   :  { %v737_v49 = vpop.permute.xlu1 %736 }
 0xcd8   :  { %v739_v50 = vadd.f32 %v737_v49, %v729_v48 }
 0xcda   :  { %2600 = vtanh.f32 %v739_v50  ;;  %v833_v0 = vrot.slane %v739_v50, 6 }
 0xce7   :  { %v2601_v51 = vpop.eup %2600 }
 0xce8   :  { %742 = vrot.lane.b32.xlu0 %v2601_v51, %s2813_s26 }
 0xd5a   :  { %v743_v53 = vpop.permute.xlu0 %742 }
 0xd5b   :  { %v745_v54 = vmul.f32 %v743_v53, %v724_v44  ;;  %v1080_v53 = vld [vmem:[#allocation7 + $0x18] sm:$0xff] }
 0xd5c   :  { %2439 = vmatprep.subr.mxu0 %v1080_v53 }
 0xd5d   :  { %747 = vrot.lane.b32.xlu1 %v745_v54, %s2814_s3  ;;  %v1079_v54 = vld [vmem:[#allocation7 + $0x10] sm:$0xff] }
 0xdcf   :  { %v748_v55 = vpop.permute.xlu1 %747 }
 0xdd0   :  { %750 = vst.msk [vmem:[#allocation2 + $0x8] sm:$0x3] %vm316_vm2, %v748_v55  ;;  %2415 = vmatmul.mubr.msk.f32.vlgmr.msra.gmra.mxu1 %vm215_vm3, %v748_v55  ;;  %v1078_v55 = vld [vmem:[#allocation7 + $0x8] sm:$0xff] }
 0xdd1   :  { %2429 = vmatpush3.msra.mxu1 %v2928_v4  ;;  %2436 = vmatprep.mubr.msk.f32.mxu1 %vm2812_vm0, %v2811_v1 }
 0xdd2   :  { %2430 = vmatprep.subr.mxu1 %v2811_v1 }
 0xdd3   :  { %2431 = vmatpush3.msra.mxu1 %v2930_v5 }
 0xdd4   :  { %2432 = vmatprep.subr.mxu1 %v2811_v1 }
 0xdd5   :  { %2433 = vmatpush3.msra.mxu1 %v2944_v9 }
 0xdd6   :  { %2434 = vmatprep.subr.mxu1 %v2811_v1 }
 0xdd7   :  { %2435 = vmatpush3.msra.mxu1 %v2951_v11 }
 0xe90   :  { %v819_v56 = vpop.f32.mrf.mxu1 }
 0xe91   :  { %v824_v57 = vrot.slane %v819_v56, 6  ;;  %v1077_v56 = vld [vmem:[#allocation7] sm:$0xff] }
 0xe92   :  { %v2416_v58 = vpop.f32.mrf.mxu1 }
 0xe93   :  { %v826_v4 = vadd.f32 %v824_v57, %v2986_v16 }
 0xe95   :  { %2602 = vtanh.f32 %v826_v4  ;;  %v827_v60 = vmul.f32 0.5, %v826_v4 }
 0xe97   :  { %2604 = vtanh.f32 %v827_v60 }
 0xea2   :  { %v2603_v59 = vpop.eup %2602 }
 0xea3   :  { %837 = vrot.lane.b32.xlu0 %v2603_v59, %s2813_s26 }
 0xea4   :  { %v2605_v5 = vpop.eup %2604 }
 0xea5   :  { %v829_v61 = vadd.f32 1.0, %v2605_v5 }
 0xea7   :  { %v830_v62 = vmul.f32 0.5, %v829_v61  ;;  %v1174_v61 = vld [vmem:[#allocation9 + $0x18] sm:$0xff] }
 0xea8   :  { %2450 = vmatprep.subr.mxu1 %v1174_v61 }
 0xea9   :  { %v835_v11 = vmul.f32 %v833_v0, %v830_v62  ;;  %v1172_v0 = vld [vmem:[#allocation9 + $0x8] sm:$0xff] }
 0xf15   :  { %v838_v63 = vpop.permute.xlu0 %837 }
 0xf16   :  { %v840_v9 = vmul.f32 %v838_v63, %v830_v62  ;;  %v3119_v63 = vld [vmem:[#allocation10 + $0x18] sm:$0xff] }
 0xf18   :  { %842 = vrot.lane.b32.xlu1 %v840_v9, %s2814_s3  ;;  %v3122_v9 = vld [vmem:[#allocation10 + $0x10] sm:$0xff] }
 0xf8a   :  { %v843_v2 = vpop.permute.xlu1 %842 }
 0xf8b   :  { %v845_v3 = vadd.f32 %v843_v2, %v835_v11  ;;  %v1171_v11 = vld [vmem:[#allocation9] sm:$0xff]  ;;  %v3128_v2 = vld [vmem:[#allocation10 + $0x8] sm:$0xff] }
 0xf8d   :  { %2606 = vtanh.f32 %v845_v3  ;;  %v942_v27 = vrot.slane %v845_v3, 6  ;;  %v3132_v3 = vld [vmem:[#allocation10] sm:$0xff] }
 0xf9a   :  { %v2607_v6 = vpop.eup %2606 }
 0xf9b   :  { %848 = vrot.lane.b32.xlu0 %v2607_v6, %s2813_s26  ;;  %v2219_v6 = vld [vmem:[%s3285_s5] ss:$0 sm:$0xff] }
0x100d   :  { %v849_v7 = vpop.permute.xlu0 %848 }
0x100e   :  { %v3083_v8 = vmul.f32 %v849_v7, %v830_v62  ;;  %v1173_v62 = vld [vmem:[#allocation9 + $0x10] sm:$0xff] }
0x1010   :  { %v857_v10 = vrot.slane %v3083_v8, 2 }
0x1012   :  { %858 = vrot.lane.b32.xlu1 %v857_v10, %s2814_s3 }
0x1084   :  { %v859_v12 = vpop.permute.xlu1 %858 }
0x1085   :  { %2426 = vmatmul.mubr.msk.f32.vlgmr.msra.gmra.mxu0 %vm215_vm3, %v859_v12 }
0x1086   :  { %2440 = vmatpush3.msra.mxu0 %v1080_v53 }
0x1087   :  { %2441 = vmatprep.subr.mxu0 %v1079_v54 }
0x1088   :  { %2442 = vmatpush3.msra.mxu0 %v1079_v54 }
0x1089   :  { %2443 = vmatprep.subr.mxu0 %v1078_v55 }
0x108a   :  { %2444 = vmatpush3.msra.mxu0 %v1078_v55 }
0x108b   :  { %2445 = vmatprep.subr.mxu0 %v1077_v56 }
0x108c   :  { %2446 = vmatpush3.msra.mxu0 %v1077_v56 }
0x108d   :  { %2461 = vmatprep.subr.mxu0 %v2811_v1 }
0x1145   :  { %v928_v14 = vpop.f32.mrf.mxu0 }
0x1146   :  { %v933_v15 = vrot.slane %v928_v14, 4 }
0x1147   :  { %v2427_v17 = vpop.f32.mrf.mxu0 }
0x1148   :  { %v935_v18 = vadd.f32 %v933_v15, %v2986_v16 }
0x114a   :  { %2608 = vtanh.f32 %v935_v18  ;;  %v936_v21 = vmul.f32 0.5, %v935_v18 }
0x114c   :  { %2610 = vtanh.f32 %v936_v21 }
0x1157   :  { %v2609_v20 = vpop.eup %2608 }
0x1158   :  { %946 = vrot.lane.b32.xlu0 %v2609_v20, %s2813_s26  ;;  %v2222_v20 = vld [vmem:[%s3288_s8] ss:$0 sm:$0xff] }
0x1159   :  { %v2611_v22 = vpop.eup %2610 }
0x115a   :  { %v938_v23 = vadd.f32 1.0, %v2611_v22 }
0x115c   :  { %v939_v24 = vmul.f32 0.5, %v938_v23 }
0x115e   :  { %v944_v28 = vmul.f32 %v942_v27, %v939_v24 }
0x11ca   :  { %v947_v25 = vpop.permute.xlu0 %946 }
0x11cb   :  { %v949_v26 = vmul.f32 %v947_v25, %v939_v24 }
0x11cd   :  { %951 = vrot.lane.b32.xlu1 %v949_v26, %s2814_s3 }
0x123f   :  { %v952_v29 = vpop.permute.xlu1 %951 }
0x1240   :  { %v954_v30 = vadd.f32 %v952_v29, %v944_v28 }
0x1242   :  { %2612 = vtanh.f32 %v954_v30 }
0x124f   :  { %v2613_v31 = vpop.eup %2612 }
0x1250   :  { %957 = vrot.lane.b32.xlu0 %v2613_v31, %s2813_s26 }
0x12c2   :  { %v958_v32 = vpop.permute.xlu0 %957 }
0x12c3   :  { %v960_v33 = vmul.f32 %v958_v32, %v939_v24 }
0x12c5   :  { %v966_v19 = vrot.slane %v960_v33, 4 }
0x12c7   :  { %967 = vrot.lane.b32.xlu1 %v966_v19, %s2814_s3 }
0x1339   :  { %v968_v35 = vpop.permute.xlu1 %967 }
0x133a   :  { %2437 = vmatmul.mubr.msk.f32.vlgmr.msra.gmra.mxu1 %vm215_vm3, %v968_v35 }
0x133b   :  { %2451 = vmatpush3.msra.mxu1 %v1174_v61 }
0x133c   :  { %2452 = vmatprep.subr.mxu1 %v1173_v62 }
0x133d   :  { %2453 = vmatpush3.msra.mxu1 %v1173_v62 }
0x133e   :  { %2454 = vmatprep.subr.mxu1 %v1172_v0 }
0x133f   :  { %2455 = vmatpush3.msra.mxu1 %v1172_v0 }
0x1340   :  { %2456 = vmatprep.subr.mxu1 %v1171_v11 }
0x1341   :  { %2457 = vmatpush3.msra.mxu1 %v1171_v11 }
0x1342   :  { %2472 = vmatprep.subr.mxu1 %v2811_v1 }
0x13fa   :  { %v1037_v36 = vpop.f32.mrf.mxu1 }
0x13fb   :  { %v1042_v37 = vrot.slane %v1037_v36, 2 }
0x13fc   :  { %v2438_v38 = vpop.f32.mrf.mxu1 }
0x13fd   :  { %v1044_v39 = vadd.f32 %v1042_v37, %v2986_v16  ;;  %v1051_v16 = vrot.slane %v954_v30, 6 }
0x13ff   :  { %2614 = vtanh.f32 %v1044_v39  ;;  %v1045_v41 = vmul.f32 0.5, %v1044_v39 }
0x1401   :  { %2616 = vtanh.f32 %v1045_v41 }
0x140c   :  { %v2615_v40 = vpop.eup %2614 }
0x140d   :  { %1055 = vrot.lane.b32.xlu0 %v2615_v40, %s2813_s26 }
0x140e   :  { %v2617_v42 = vpop.eup %2616 }
0x140f   :  { %v1047_v43 = vadd.f32 1.0, %v2617_v42 }
0x1411   :  { %v1048_v44 = vmul.f32 0.5, %v1047_v43 }
0x1413   :  { %v1053_v47 = vmul.f32 %v1051_v16, %v1048_v44 }
0x147f   :  { %v1056_v45 = vpop.permute.xlu0 %1055 }
0x1480   :  { %v1058_v46 = vmul.f32 %v1056_v45, %v1048_v44 }
0x1482   :  { %1060 = vrot.lane.b32.xlu1 %v1058_v46, %s2814_s3 }
0x1486   :  { %420 = vrot.lane.b32.xlu1 %v3011_v52, %s2814_s3 }
0x148a   :  { %640 = vrot.lane.b32.xlu1 %v3049_v34, %s2814_s3 }
0x148e   :  { %962 = vrot.lane.b32.xlu1 %v960_v33, %s2814_s3 }
0x14f4   :  { %v1061_v48 = vpop.permute.xlu1 %1060 }
0x14f5   :  { %v1063_v49 = vadd.f32 %v1061_v48, %v1053_v47 }
0x14f7   :  { %2618 = vtanh.f32 %v1063_v49 }
0x14f8   :  { %v421_v50 = vpop.permute.xlu1 %420 }
0x14f9   :  { %424 = vst.msk [vmem:[#allocation2] sm:$0xc] %vm423_vm4, %v421_v50 }
0x14fc   :  { %v641_v51 = vpop.permute.xlu1 %640 }
0x14fd   :  { %644 = vst.msk [vmem:[#allocation2] sm:$0xc0] %vm643_vm5, %v641_v51 }
0x1500   :  { %v963_v52 = vpop.permute.xlu1 %962 }
0x1501   :  { %965 = vst.msk [vmem:[#allocation2 + $0x8] sm:$0x30] %vm533_vm6, %v963_v52 }
0x1504   :  { %v2619_v34 = vpop.eup %2618 }
0x1505   :  { %1066 = vrot.lane.b32.xlu0 %v2619_v34, %s2813_s26 }
0x1509   :  { %530 = vrot.lane.b32.xlu0 %v3030_v13, %s2814_s3 }
0x150d   :  { %853 = vrot.lane.b32.xlu0 %v3083_v8, %s2814_s3 }
0x1577   :  { %v1067_v57 = vpop.permute.xlu0 %1066 }
0x1578   :  { %v1069_v58 = vmul.f32 %v1067_v57, %v1048_v44 }
0x157a   :  { %1071 = vrot.lane.b32.xlu0 %v1069_v58, %s2814_s3 }
0x157b   :  { %v531_v13 = vpop.permute.xlu0 %530 }
0x157c   :  { %534 = vst.msk [vmem:[#allocation2] sm:$0x30] %vm533_vm6, %v531_v13 }
0x157f   :  { %v854_v4 = vpop.permute.xlu0 %853 }
0x1580   :  { %856 = vst.msk [vmem:[#allocation2 + $0x8] sm:$0xc] %vm423_vm4, %v854_v4 }
0x1583   :  { %v1075_v59 = vld [vmem:[#allocation2] sm:$0xff] }
0x1584   :  { %2447 = vmatprep.mubr.msk.f32.mxu0 %vm215_vm3, %v1075_v59 }
0x15ec   :  { %v1072_v60 = vpop.permute.xlu0 %1071 }
0x15ed   :  { %1074 = vst.msk [vmem:[#allocation2 + $0x8] sm:$0xc0] %vm643_vm5, %v1072_v60 }
0x15f4   :  { %v1076_v5 = vld [vmem:[#allocation2 + $0x8] sm:$0xff] }
0x15f5   :  { %2448 = vmatmul.mubr.msk.f32.vlgmr.msra.gmra.mxu0 %vm215_vm3, %v1076_v5 }
0x15f6   :  { %2469 = vmatprep.mubr.msk.f32.mxu0 %vm2812_vm0, %v2811_v1  ;;  %2462 = vmatpush3.msra.mxu0 %v3119_v63 }
0x15f7   :  { %2463 = vmatprep.subr.mxu0 %v2811_v1 }
0x15f8   :  { %2464 = vmatpush3.msra.mxu0 %v3122_v9 }
0x15f9   :  { %2465 = vmatprep.subr.mxu0 %v2811_v1 }
0x15fa   :  { %2466 = vmatpush3.msra.mxu0 %v3128_v2 }
0x15fb   :  { %2467 = vmatprep.subr.mxu0 %v2811_v1 }
0x15fc   :  { %2468 = vmatpush3.msra.mxu0 %v3132_v3 }
0x15fd   :  { %2470 = vmatmul.mubr.f32.vlgmr.msra.gmra.mxu0 %v2811_v1  ;;  %2483 = vmatprep.subr.mxu0 %v2811_v1 }
0x15fe   :  { %2484 = vmatpush3.msra.mxu0 %v3119_v63  ;;  %2491 = vmatprep.mubr.msk.f32.mxu0 %vm2812_vm0, %v2811_v1 }
0x15ff   :  { %2485 = vmatprep.subr.mxu0 %v2811_v1 }
0x1600   :  { %2486 = vmatpush3.msra.mxu0 %v3122_v9 }
0x1601   :  { %2487 = vmatprep.subr.mxu0 %v2811_v1 }
0x1602   :  { %2488 = vmatpush3.msra.mxu0 %v3128_v2 }
0x1603   :  { %2489 = vmatprep.subr.mxu0 %v2811_v1 }
0x1604   :  { %2490 = vmatpush3.msra.mxu0 %v3132_v3 }
0x1605   :  { %2505 = vmatprep.subr.mxu0 %v2811_v1 }
0x16b5   :  { %v2449_v7 = vpop.f32.mrf.mxu0 }
0x16b6   :  { %v1166_v8 = vadd.f32 %v2449_v7, %v2219_v6 }
0x16b7   :  { %v1160_v10 = vpop.f32.mrf.mxu0 }
0x16b8   :  { %v1161_v12 = vadd.f32 %v2219_v6, %v1160_v10 }
0x16ba   :  { %2620 = vtanh.f32 %v1161_v12 }
0x16bb   :  { %2622 = vtanh.f32 %v1166_v8 }
0x16bd   :  { %v1333_v17 = vpop.f32.mrf.mxu0 }
0x16bf   :  { %v2471_v18 = vpop.f32.mrf.mxu0 }
0x16c7   :  { %v2621_v14 = vpop.eup %2620 }
0x16c8   :  { %v2623_v15 = vpop.eup %2622  ;;  %2458 = vmatprep.mubr.msk.f32.mxu1 %vm215_vm3, %v2621_v14 }
0x16c9   :  { %2459 = vmatmul.mubr.msk.f32.vlgmr.msra.gmra.mxu1 %vm215_vm3, %v2623_v15 }
0x16ca   :  { %2473 = vmatpush3.msra.mxu1 %v3119_v63  ;;  %2480 = vmatprep.mubr.msk.f32.mxu1 %vm2812_vm0, %v2811_v1 }
0x16cb   :  { %2474 = vmatprep.subr.mxu1 %v2811_v1 }
0x16cc   :  { %2475 = vmatpush3.msra.mxu1 %v3122_v9 }
0x16cd   :  { %2476 = vmatprep.subr.mxu1 %v2811_v1 }
0x16ce   :  { %2477 = vmatpush3.msra.mxu1 %v3128_v2 }
0x16cf   :  { %2478 = vmatprep.subr.mxu1 %v2811_v1 }
0x16d0   :  { %2479 = vmatpush3.msra.mxu1 %v3132_v3 }
0x16d1   :  { %2494 = vmatprep.subr.mxu1 %v2811_v1 }
0x1789   :  { %v2460_v21 = vpop.f32.mrf.mxu1 }
0x178a   :  { %v3165_v22 = vadd.f32 %v2460_v21, %v2222_v20 }
0x178b   :  { %v1254_v23 = vpop.f32.mrf.mxu1 }
0x178c   :  { %v3167_v24 = vadd.f32 %v2222_v20, %v1254_v23 }
0x178e   :  { %v1337_v25 = vadd.f32 %v1333_v17, %v3167_v24 }
0x1790   :  { %2624 = vtanh.f32 %v1337_v25  ;;  %v1338_v27 = vmul.f32 0.5, %v1337_v25 }
0x1792   :  { %2626 = vtanh.f32 %v1338_v27 }
0x179d   :  { %v2625_v26 = vpop.eup %2624 }
0x179e   :  { %1345 = vrot.lane.b32.xlu1 %v2625_v26, %s2813_s26 }
0x179f   :  { %v2627_v28 = vpop.eup %2626 }
0x17a0   :  { %v1340_v29 = vadd.f32 1.0, %v2627_v28 }
0x17a2   :  { %v1341_v30 = vmul.f32 0.5, %v1340_v29 }
0x17a4   :  { %v1343_v33 = vmul.f32 0.0, %v1341_v30 }
0x1810   :  { %v1346_v31 = vpop.permute.xlu1 %1345 }
0x1811   :  { %v1348_v32 = vmul.f32 %v1346_v31, %v1341_v30 }
0x1813   :  { %1350 = vrot.lane.b32.xlu0 %v1348_v32, %s2814_s3 }
0x1885   :  { %v1351_v19 = vpop.permute.xlu0 %1350 }
0x1886   :  { %v1353_v35 = vadd.f32 %v1351_v19, %v1343_v33 }
0x1888   :  { %2628 = vtanh.f32 %v1353_v35  ;;  %v1445_v50 = vrot.slane %v1353_v35, 6 }
0x1895   :  { %v2629_v36 = vpop.eup %2628 }
0x1896   :  { %1356 = vrot.lane.b32.xlu1 %v2629_v36, %s2813_s26 }
0x1908   :  { %v1357_v37 = vpop.permute.xlu1 %1356 }
0x1909   :  { %v1359_v38 = vmul.f32 %v1357_v37, %v1341_v30 }
0x190b   :  { %1361 = vrot.lane.b32.xlu0 %v1359_v38, %s2814_s3 }
0x197d   :  { %v1362_v39 = vpop.permute.xlu0 %1361 }
0x197e   :  { %2481 = vmatmul.mubr.msk.f32.vlgmr.msra.gmra.mxu1 %vm215_vm3, %v1362_v39 }
0x197f   :  { %2495 = vmatpush3.msra.mxu1 %v3119_v63  ;;  %2502 = vmatprep.mubr.msk.f32.mxu1 %vm2812_vm0, %v2811_v1 }
0x1980   :  { %2496 = vmatprep.subr.mxu1 %v2811_v1 }
0x1981   :  { %2497 = vmatpush3.msra.mxu1 %v3122_v9 }
0x1982   :  { %2498 = vmatprep.subr.mxu1 %v2811_v1 }
0x1983   :  { %2499 = vmatpush3.msra.mxu1 %v3128_v2 }
0x1984   :  { %2500 = vmatprep.subr.mxu1 %v2811_v1 }
0x1985   :  { %2501 = vmatpush3.msra.mxu1 %v3132_v3 }
0x1986   :  { %2516 = vmatprep.subr.mxu1 %v2811_v1 }
0x1a3e   :  { %v1431_v40 = vpop.f32.mrf.mxu1 }
0x1a3f   :  { %v1436_v41 = vrot.slane %v1431_v40, 6 }
0x1a40   :  { %v2482_v42 = vpop.f32.mrf.mxu1 }
0x1a41   :  { %v1438_v43 = vadd.f32 %v1436_v41, %v3167_v24 }
0x1a43   :  { %2630 = vtanh.f32 %v1438_v43  ;;  %v1439_v45 = vmul.f32 0.5, %v1438_v43 }
0x1a45   :  { %2632 = vtanh.f32 %v1439_v45 }
0x1a50   :  { %v2631_v44 = vpop.eup %2630 }
0x1a51   :  { %1449 = vrot.lane.b32.xlu1 %v2631_v44, %s2813_s26 }
0x1a52   :  { %v2633_v46 = vpop.eup %2632 }
0x1a53   :  { %v1441_v16 = vadd.f32 1.0, %v2633_v46 }
0x1a55   :  { %v1442_v47 = vmul.f32 0.5, %v1441_v16 }
0x1a57   :  { %v1447_v51 = vmul.f32 %v1445_v50, %v1442_v47 }
0x1ac3   :  { %v1450_v48 = vpop.permute.xlu1 %1449 }
0x1ac4   :  { %v1452_v49 = vmul.f32 %v1450_v48, %v1442_v47 }
0x1ac6   :  { %1454 = vrot.lane.b32.xlu0 %v1452_v49, %s2814_s3 }
0x1b38   :  { %v1455_v52 = vpop.permute.xlu0 %1454 }
0x1b39   :  { %v1457_v34 = vadd.f32 %v1455_v52, %v1447_v51 }
0x1b3b   :  { %2634 = vtanh.f32 %v1457_v34  ;;  %v1550_v7 = vrot.slane %v1457_v34, 6 }
0x1b48   :  { %v2635_v53 = vpop.eup %2634 }
0x1b49   :  { %1460 = vrot.lane.b32.xlu1 %v2635_v53, %s2813_s26 }
0x1bbb   :  { %v1461_v54 = vpop.permute.xlu1 %1460 }
0x1bbc   :  { %v1463_v55 = vmul.f32 %v1461_v54, %v1442_v47 }
0x1bbe   :  { %v1465_v56 = vrot.slane %v1463_v55, 2 }
0x1bc0   :  { %1466 = vrot.lane.b32.xlu0 %v1465_v56, %s2814_s3 }
0x1c32   :  { %v1467_v57 = vpop.permute.xlu0 %1466 }
0x1c33   :  { %2492 = vmatmul.mubr.msk.f32.vlgmr.msra.gmra.mxu0 %vm215_vm3, %v1467_v57 }
0x1c34   :  { %2506 = vmatpush3.msra.mxu0 %v3119_v63  ;;  %2513 = vmatprep.mubr.msk.f32.mxu0 %vm2812_vm0, %v2811_v1 }
0x1c35   :  { %2507 = vmatprep.subr.mxu0 %v2811_v1 }
0x1c36   :  { %2508 = vmatpush3.msra.mxu0 %v3122_v9 }
0x1c37   :  { %2509 = vmatprep.subr.mxu0 %v2811_v1 }
0x1c38   :  { %2510 = vmatpush3.msra.mxu0 %v3128_v2 }
0x1c39   :  { %2511 = vmatprep.subr.mxu0 %v2811_v1 }
0x1c3a   :  { %2512 = vmatpush3.msra.mxu0 %v3132_v3 }
0x1c3b   :  { %2527 = vmatprep.subr.mxu0 %v2811_v1 }
0x1cf3   :  { %v1536_v58 = vpop.f32.mrf.mxu0 }
0x1cf4   :  { %v1541_v13 = vrot.slane %v1536_v58, 4 }
0x1cf5   :  { %v2493_v4 = vpop.f32.mrf.mxu0 }
0x1cf6   :  { %v1543_v59 = vadd.f32 %v1541_v13, %v3167_v24 }
0x1cf8   :  { %2636 = vtanh.f32 %v1543_v59  ;;  %v1544_v5 = vmul.f32 0.5, %v1543_v59 }
0x1cfa   :  { %2638 = vtanh.f32 %v1544_v5 }
0x1d05   :  { %v2637_v60 = vpop.eup %2636 }
0x1d06   :  { %1554 = vrot.lane.b32.xlu1 %v2637_v60, %s2813_s26 }
0x1d07   :  { %v2639_v61 = vpop.eup %2638 }
0x1d08   :  { %v1546_v62 = vadd.f32 1.0, %v2639_v61 }
0x1d0a   :  { %v1547_v0 = vmul.f32 0.5, %v1546_v62 }
0x1d0c   :  { %v1552_v8 = vmul.f32 %v1550_v7, %v1547_v0 }
0x1d78   :  { %v1555_v11 = vpop.permute.xlu1 %1554 }
0x1d79   :  { %v1557_v6 = vmul.f32 %v1555_v11, %v1547_v0 }
0x1d7b   :  { %1559 = vrot.lane.b32.xlu0 %v1557_v6, %s2814_s3 }
0x1ded   :  { %v1560_v10 = vpop.permute.xlu0 %1559 }
0x1dee   :  { %v1562_v12 = vadd.f32 %v1560_v10, %v1552_v8 }
0x1df0   :  { %2640 = vtanh.f32 %v1562_v12  ;;  %v1655_v19 = vrot.slane %v1562_v12, 6 }
0x1dfd   :  { %v2641_v14 = vpop.eup %2640 }
0x1dfe   :  { %1565 = vrot.lane.b32.xlu1 %v2641_v14, %s2813_s26 }
0x1e70   :  { %v1566_v15 = vpop.permute.xlu1 %1565 }
0x1e71   :  { %v1568_v17 = vmul.f32 %v1566_v15, %v1547_v0 }
0x1e73   :  { %v1570_v18 = vrot.slane %v1568_v17, 4 }
0x1e75   :  { %1571 = vrot.lane.b32.xlu0 %v1570_v18, %s2814_s3 }
0x1ee7   :  { %v1572_v20 = vpop.permute.xlu0 %1571 }
0x1ee8   :  { %2503 = vmatmul.mubr.msk.f32.vlgmr.msra.gmra.mxu1 %vm215_vm3, %v1572_v20 }
0x1ee9   :  { %2517 = vmatpush3.msra.mxu1 %v3119_v63  ;;  %2524 = vmatprep.mubr.msk.f32.mxu1 %vm2812_vm0, %v2811_v1 }
0x1eea   :  { %2518 = vmatprep.subr.mxu1 %v2811_v1 }
0x1eeb   :  { %2519 = vmatpush3.msra.mxu1 %v3122_v9 }
0x1eec   :  { %2520 = vmatprep.subr.mxu1 %v2811_v1 }
0x1eed   :  { %2521 = vmatpush3.msra.mxu1 %v3128_v2 }
0x1eee   :  { %2522 = vmatprep.subr.mxu1 %v2811_v1 }
0x1eef   :  { %2523 = vmatpush3.msra.mxu1 %v3132_v3 }
0x1ef0   :  { %2538 = vmatprep.subr.mxu1 %v2811_v1 }
0x1fa8   :  { %v1641_v21 = vpop.f32.mrf.mxu1 }
0x1fa9   :  { %v1646_v23 = vrot.slane %v1641_v21, 2 }
0x1faa   :  { %v2504_v25 = vpop.f32.mrf.mxu1 }
0x1fab   :  { %v1648_v26 = vadd.f32 %v1646_v23, %v3167_v24 }
0x1fad   :  { %2642 = vtanh.f32 %v1648_v26  ;;  %v1649_v28 = vmul.f32 0.5, %v1648_v26 }
0x1faf   :  { %2644 = vtanh.f32 %v1649_v28 }
0x1fba   :  { %v2643_v27 = vpop.eup %2642 }
0x1fbb   :  { %1659 = vrot.lane.b32.xlu1 %v2643_v27, %s2813_s26 }
0x1fbc   :  { %v2645_v29 = vpop.eup %2644 }
0x1fbd   :  { %v1651_v30 = vadd.f32 1.0, %v2645_v29 }
0x1fbf   :  { %v1652_v31 = vmul.f32 0.5, %v1651_v30 }
0x1fc1   :  { %v1657_v35 = vmul.f32 %v1655_v19, %v1652_v31 }
0x202d   :  { %v1660_v32 = vpop.permute.xlu1 %1659 }
0x202e   :  { %v1662_v33 = vmul.f32 %v1660_v32, %v1652_v31 }
0x2030   :  { %1664 = vrot.lane.b32.xlu0 %v1662_v33, %s2814_s3 }
0x20a2   :  { %v1665_v36 = vpop.permute.xlu0 %1664 }
0x20a3   :  { %v1667_v37 = vadd.f32 %v1665_v36, %v1657_v35 }
0x20a5   :  { %2646 = vtanh.f32 %v1667_v37  ;;  %v1757_v51 = vrot.slane %v1667_v37, 6 }
0x20b2   :  { %v2647_v38 = vpop.eup %2646 }
0x20b3   :  { %1670 = vrot.lane.b32.xlu1 %v2647_v38, %s2813_s26 }
0x2125   :  { %v1671_v24 = vpop.permute.xlu1 %1670 }
0x2126   :  { %v1673_v39 = vmul.f32 %v1671_v24, %v1652_v31 }
0x2128   :  { %v1675_v40 = vrot.slane %v1673_v39, 6 }
0x212a   :  { %1676 = vrot.lane.b32.xlu0 %v1675_v40, %s2814_s3 }
0x219c   :  { %v1677_v41 = vpop.permute.xlu0 %1676 }
0x219d   :  { %2514 = vmatmul.mubr.msk.f32.vlgmr.msra.gmra.mxu0 %vm215_vm3, %v1677_v41 }
0x219e   :  { %2528 = vmatpush3.msra.mxu0 %v3119_v63  ;;  %2535 = vmatprep.mubr.msk.f32.mxu0 %vm2812_vm0, %v2811_v1 }
0x219f   :  { %2529 = vmatprep.subr.mxu0 %v2811_v1 }
0x21a0   :  { %2530 = vmatpush3.msra.mxu0 %v3122_v9 }
0x21a1   :  { %2531 = vmatprep.subr.mxu0 %v2811_v1 }
0x21a2   :  { %2532 = vmatpush3.msra.mxu0 %v3128_v2 }
0x21a3   :  { %2533 = vmatprep.subr.mxu0 %v2811_v1 }
0x21a4   :  { %2534 = vmatpush3.msra.mxu0 %v3132_v3 }
0x21a5   :  { %2549 = vmatprep.subr.mxu0 %v2811_v1 }
0x225d   :  { %v1746_v42 = vpop.f32.mrf.mxu0 }
0x225e   :  { %v1750_v43 = vadd.f32 %v1746_v42, %v3165_v22 }
0x225f   :  { %v2515_v44 = vpop.f32.mrf.mxu0 }
0x2260   :  { %2648 = vtanh.f32 %v1750_v43  ;;  %v1751_v46 = vmul.f32 0.5, %v1750_v43 }
0x2262   :  { %2650 = vtanh.f32 %v1751_v46 }
0x226d   :  { %v2649_v45 = vpop.eup %2648 }
0x226e   :  { %1761 = vrot.lane.b32.xlu1 %v2649_v45, %s2813_s26 }
0x226f   :  { %v2651_v16 = vpop.eup %2650 }
0x2270   :  { %v1753_v47 = vadd.f32 1.0, %v2651_v16 }
0x2272   :  { %v1754_v48 = vmul.f32 0.5, %v1753_v47 }
0x2274   :  { %v1759_v52 = vmul.f32 %v1757_v51, %v1754_v48 }
0x22e0   :  { %v1762_v49 = vpop.permute.xlu1 %1761 }
0x22e1   :  { %v1764_v50 = vmul.f32 %v1762_v49, %v1754_v48 }
0x22e3   :  { %1766 = vrot.lane.b32.xlu0 %v1764_v50, %s2814_s3 }
0x2355   :  { %v1767_v34 = vpop.permute.xlu0 %1766 }
0x2356   :  { %v1769_v53 = vadd.f32 %v1767_v34, %v1759_v52  ;;  %v2093_v52 = vld [vmem:[#allocation12 + $0x18] sm:$0xff]  ;;  %v2091_v34 = vld [vmem:[#allocation12 + $0x8] sm:$0xff] }
0x2358   :  { %2652 = vtanh.f32 %v1769_v53  ;;  %v1861_v0 = vrot.slane %v1769_v53, 6  ;;  %v2090_v53 = vld [vmem:[#allocation12] sm:$0xff] }
0x2365   :  { %v2653_v54 = vpop.eup %2652 }
0x2366   :  { %1772 = vrot.lane.b32.xlu1 %v2653_v54, %s2813_s26 }
0x23d8   :  { %v1773_v55 = vpop.permute.xlu1 %1772 }
0x23d9   :  { %v1775_v56 = vmul.f32 %v1773_v55, %v1754_v48 }
0x23db   :  { %1777 = vrot.lane.b32.xlu0 %v1775_v56, %s2814_s3 }
0x244d   :  { %v1778_v57 = vpop.permute.xlu0 %1777 }
0x244e   :  { %2525 = vmatmul.mubr.msk.f32.vlgmr.msra.gmra.mxu1 %vm215_vm3, %v1778_v57 }
0x244f   :  { %2539 = vmatpush3.msra.mxu1 %v3119_v63  ;;  %2546 = vmatprep.mubr.msk.f32.mxu1 %vm2812_vm0, %v2811_v1 }
0x2450   :  { %2540 = vmatprep.subr.mxu1 %v2811_v1 }
0x2451   :  { %2541 = vmatpush3.msra.mxu1 %v3122_v9 }
0x2452   :  { %2542 = vmatprep.subr.mxu1 %v2811_v1 }
0x2453   :  { %2543 = vmatpush3.msra.mxu1 %v3128_v2 }
0x2454   :  { %2544 = vmatprep.subr.mxu1 %v2811_v1 }
0x2455   :  { %2545 = vmatpush3.msra.mxu1 %v3132_v3 }
0x250e   :  { %v1847_v58 = vpop.f32.mrf.mxu1 }
0x250f   :  { %v1852_v13 = vrot.slane %v1847_v58, 6 }
0x2510   :  { %v2526_v4 = vpop.f32.mrf.mxu1 }
0x2511   :  { %v1854_v63 = vadd.f32 %v1852_v13, %v3165_v22  ;;  %v2232_v13 = vld [vmem:[%s3290_s10] ss:$0 sm:$0xff]  ;;  %s2815_s10 = smov [#allocation13]  }
0x2512   :  { %s2198_s2 = sshll.u32 %s2815_s10, 4  ;;  %s2199_s2 = int_to_ptr.vmem [resolvable:$true] %s2198_s2 }
0x2513   :  { %2654 = vtanh.f32 %v1854_v63  ;;  %v1855_v60 = vmul.f32 0.5, %v1854_v63  ;;  %s2776_s16 = scalar_lea.vmem %s2199_s2, 16  ;;  %p2781_p12 = scmp.lt.s32.totalorder %s2199_s2, %s2199_s2 }
0x2514   :  { %p2777_p11 = scmp.ne.s32.totalorder %s2199_s2, %s2776_s16 }
0x2515   :  { %2656 = vtanh.f32 %v1855_v60 }
0x2520   :  { %v2655_v59 = vpop.eup %2654 }
0x2521   :  { %1865 = vrot.lane.b32.xlu1 %v2655_v59, %s2813_s26 }
0x2522   :  { %v2657_v9 = vpop.eup %2656 }
0x2523   :  { %v1857_v5 = vadd.f32 1.0, %v2657_v9 }
0x2525   :  { %v1858_v61 = vmul.f32 0.5, %v1857_v5 }
0x2527   :  { %v1863_v3 = vmul.f32 %v1861_v0, %v1858_v61 }
0x2593   :  { %v1866_v62 = vpop.permute.xlu1 %1865 }
0x2594   :  { %v1868_v2 = vmul.f32 %v1866_v62, %v1858_v61 }
0x2596   :  { %1870 = vrot.lane.b32.xlu0 %v1868_v2, %s2814_s3 }
0x2608   :  { %v1871_v11 = vpop.permute.xlu0 %1870 }
0x2609   :  { %v1873_v6 = vadd.f32 %v1871_v11, %v1863_v3 }
0x260b   :  { %2658 = vtanh.f32 %v1873_v6  ;;  %v1966_v30 = vrot.slane %v1873_v6, 6 }
0x2618   :  { %v2659_v7 = vpop.eup %2658 }
0x2619   :  { %1876 = vrot.lane.b32.xlu1 %v2659_v7, %s2813_s26 }
0x268b   :  { %v1877_v8 = vpop.permute.xlu1 %1876 }
0x268c   :  { %v1879_v10 = vmul.f32 %v1877_v8, %v1858_v61  ;;  %v2184_v61 = vld [vmem:[#allocation3] sm:$0x1] }
0x268e   :  { %v1881_v12 = vrot.slane %v1879_v10, 2 }
0x2690   :  { %1882 = vrot.lane.b32.xlu0 %v1881_v12, %s2814_s3 }
0x2702   :  { %v1883_v14 = vpop.permute.xlu0 %1882 }
0x2703   :  { %2536 = vmatmul.mubr.msk.f32.vlgmr.msra.gmra.mxu0 %vm215_vm3, %v1883_v14 }
0x2704   :  { %2557 = vmatprep.mubr.msk.f32.mxu0 %vm2812_vm0, %v2811_v1  ;;  %2550 = vmatpush3.msra.mxu0 %v2093_v52 }
0x2705   :  { %2551 = vmatprep.subr.mxu0 %v2811_v1 }
0x27c3   :  { %v1952_v15 = vpop.f32.mrf.mxu0 }
0x27c4   :  { %v1957_v17 = vrot.slane %v1952_v15, 4 }
0x27c5   :  { %v2537_v18 = vpop.f32.mrf.mxu0 }
0x27c6   :  { %v1959_v20 = vadd.f32 %v1957_v17, %v3165_v22 }
0x27c8   :  { %2660 = vtanh.f32 %v1959_v20  ;;  %v1960_v23 = vmul.f32 0.5, %v1959_v20 }
0x27ca   :  { %2662 = vtanh.f32 %v1960_v23 }
0x27d5   :  { %v2661_v21 = vpop.eup %2660 }
0x27d6   :  { %1970 = vrot.lane.b32.xlu1 %v2661_v21, %s2813_s26 }
0x27d7   :  { %v2663_v25 = vpop.eup %2662 }
0x27d8   :  { %v1962_v26 = vadd.f32 1.0, %v2663_v25 }
0x27da   :  { %v1963_v27 = vmul.f32 0.5, %v1962_v26 }
0x27dc   :  { %v1968_v31 = vmul.f32 %v1966_v30, %v1963_v27 }
0x2848   :  { %v1971_v28 = vpop.permute.xlu1 %1970 }
0x2849   :  { %v1973_v29 = vmul.f32 %v1971_v28, %v1963_v27 }
0x284b   :  { %1975 = vrot.lane.b32.xlu0 %v1973_v29, %s2814_s3 }
0x28bd   :  { %v1976_v32 = vpop.permute.xlu0 %1975 }
0x28be   :  { %v1978_v33 = vadd.f32 %v1976_v32, %v1968_v31 }
0x28c0   :  { %2664 = vtanh.f32 %v1978_v33  ;;  %v2071_v48 = vrot.slane %v1978_v33, 6 }
0x28cd   :  { %v2665_v19 = vpop.eup %2664 }
0x28ce   :  { %1981 = vrot.lane.b32.xlu1 %v2665_v19, %s2813_s26 }
0x2940   :  { %v1982_v35 = vpop.permute.xlu1 %1981 }
0x2941   :  { %v1984_v36 = vmul.f32 %v1982_v35, %v1963_v27 }
0x2943   :  { %v1986_v37 = vrot.slane %v1984_v36, 4 }
0x2945   :  { %1987 = vrot.lane.b32.xlu0 %v1986_v37, %s2814_s3 }
0x29b7   :  { %v1988_v38 = vpop.permute.xlu0 %1987 }
0x29b8   :  { %2547 = vmatmul.mubr.msk.f32.vlgmr.msra.gmra.mxu1 %vm215_vm3, %v1988_v38 }
0x2a78   :  { %v2057_v24 = vpop.f32.mrf.mxu1 }
0x2a79   :  { %v2062_v39 = vrot.slane %v2057_v24, 2 }
0x2a7a   :  { %v2548_v40 = vpop.f32.mrf.mxu1 }
0x2a7b   :  { %v2064_v41 = vadd.f32 %v2062_v39, %v3165_v22  ;;  %v2092_v22 = vld [vmem:[#allocation12 + $0x10] sm:$0xff] }
0x2a7c   :  { %2552 = vmatpush3.msra.mxu0 %v2092_v22 }
0x2a7d   :  { %2666 = vtanh.f32 %v2064_v41  ;;  %v2065_v43 = vmul.f32 0.5, %v2064_v41  ;;  %2553 = vmatprep.subr.mxu0 %v2811_v1 }
0x2a7e   :  { %2554 = vmatpush3.msra.mxu0 %v2091_v34 }
0x2a7f   :  { %2668 = vtanh.f32 %v2065_v43  ;;  %2555 = vmatprep.subr.mxu0 %v2811_v1  ;;  %v2178_v1 = vld [vmem:[%s3291_s11] sm:$0x1]  ;;  %s2780_s11 = scalar_lea.vmem %s2199_s2, 32 }
0x2a80   :  { %2556 = vmatpush3.msra.mxu0 %v2090_v53  ;;  %p2782_p13 = scmp.lt.s32.totalorder %s2780_s11, %s2776_s16 }
0x2a82   :  { %p2783_p0 = por %p2782_p13, %p2781_p12 }
0x2a84   :  { %p2784_p1 = pnand %p2783_p0, %p2777_p11 }
0x2a8a   :  { %v2667_v42 = vpop.eup %2666 }
0x2a8b   :  { %2075 = vrot.lane.b32.xlu1 %v2667_v42, %s2813_s26 }
0x2a8c   :  { %v2669_v44 = vpop.eup %2668 }
0x2a8d   :  { %v2067_v45 = vadd.f32 1.0, %v2669_v44 }
0x2a8f   :  { %v2068_v46 = vmul.f32 0.5, %v2067_v45 }
0x2a91   :  { %v2073_v49 = vmul.f32 %v2071_v48, %v2068_v46 }
0x2afd   :  { %v2076_v16 = vpop.permute.xlu1 %2075 }
0x2afe   :  { %v2078_v47 = vmul.f32 %v2076_v16, %v2068_v46 }
0x2b00   :  { %2080 = vrot.lane.b32.xlu0 %v2078_v47, %s2814_s3 }
0x2b72   :  { %v2081_v50 = vpop.permute.xlu0 %2080 }
0x2b73   :  { %v2083_v51 = vadd.f32 %v2081_v50, %v2073_v49 }
0x2b75   :  { %2670 = vtanh.f32 %v2083_v51 }
0x2b82   :  { %v2671_v54 = vpop.eup %2670 }
0x2b83   :  { %2086 = vrot.lane.b32.xlu1 %v2671_v54, %s2813_s26 }
0x2bf5   :  { %v2087_v55 = vpop.permute.xlu1 %2086 }
0x2bf6   :  { %v2089_v56 = vmul.f32 %v2087_v55, %v2068_v46 }
0x2bf8   :  { %v2102_v57 = vrot.slane %v2089_v56, 6 }
0x2bfa   :  { %2103 = vrot.lane.b32.xlu0 %v2102_v57, %s2814_s3 }
0x2c6c   :  { %v2104_v58 = vpop.permute.xlu0 %2103 }
0x2c6d   :  { %2558 = vmatmul.mubr.msk.f32.vlgmr.msra.gmra.mxu0 %vm215_vm3, %v2104_v58 }
0x2d2d   :  { %v2173_v4 = vpop.f32.mrf.mxu0 }
0x2d2e   :  { %v2174_v63 = vadd.f32 %v2232_v13, %v2173_v4 }
0x2d2f   :  { %v2559_v59 = vpop.f32.mrf.mxu0 }
0x2d30   :  { %2672 = vtanh.f32 %v2174_v63 }
0x2d3d   :  { %v2673_v60 = vpop.eup %2672 }
0x2d3e   :  { %v2179_v9 = vmul.f32 %v2673_v60, %v2178_v1 }
0x2d40   :  { %v2181_v5 = vsel %vm2180_vm7, %v2179_v9, 0.0 }
0x2d41   :  { %2182 = vadd.xlane.f32.xlu1 %v2181_v5 }
0x2dca   :  { %v2183_v62 = vpop.xlane.xlu1 %2182 }
0x2dcb   :  { %v2185_v2 = vadd.f32 %v2184_v61, %v2183_v62 }
0x2dcd   :  { %v2186_v0 = vmul.f32 0.5, %v2185_v2 }
0x2dcf   :  { %2674 = vtanh.f32 %v2186_v0 }
0x2ddc   :  { %v2675_v3 = vpop.eup %2674 }
0x2ddd   :  { %v2188_v11 = vadd.f32 1.0, %v2675_v3 }
0x2ddf   :  { %v2189_v6 = vmul.f32 0.5, %v2188_v11 }
0x2de1   :  { %2191 = vst.msk [vmem:[#allocation13] sm:$0x1] %vm2190_vm8, %v2189_v6 }
0x2de2   :  { %2787 = shalt.err (!%p2784_p1)
}
0x2de3   :  { %2201 = dma.vmem_to_hbm [thread:$0]  %s2199_s2, 16, %s3293_s13, [#allocation6]  }
0x2de4   :  { %2802 = dma.done.wait [#allocation6], 16  }
0x2de5   :  { %2803 = vsyncadd [#allocation6], 4294967280 }
0x2de6   :  { %2205 = vsyncpa [#allocation5], 1 }
0x2de7   :  { %2206 = vsyncpa [#allocation8], 1 }
0x2de8   :  { %2207 = vsyncpa [#allocation11], 1 }
0x2de9   :  { %2208 = vsyncpa [#allocation6], 1 }

</bundles_post_ra>
